<compile_context>
chip_gen: v5e
topology: v5e:2x2
jax: 0.10.0
libtpu: 0.0.40
codegen_flags: <defaults>
</compile_context>

<pallas_src>
import jax
import jax.numpy as jnp
from jax.experimental import pallas as pl
from jax.experimental.pallas import tpu as pltpu

# Module-consistent dimensions (default encoder_args: 4 layers, input 128,
# hidden 64, output 16; nmb_prototypes=8).
NUM_LAYERS = 4
DIN = 128        # encoder input dimension
HID = 64         # encoder hidden dimension
DOUT = 16        # encoder output dimension
K = 8            # nmb_prototypes

NPG = 8          # nodes per graph
GB = 16          # graphs per grid block
NB = GB * NPG    # nodes per grid block = 128 (MXU / v5e friendly tile)
NUM_BLOCKS = 4   # grid length (>= 2 steps per TensorCore on v7x)
G = GB * NUM_BLOCKS          # total graphs in the batch = 64
N = NB * NUM_BLOCKS          # total nodes = 512
N_SLAB = 2 * NUM_LAYERS      # 8 slices: MLP weights (minus first-layer w1) + prototype W^T
OUT_W = 2 * HID              # 128-lane fused output slab (y | prototype scores)


def pgcl_kernel(a_ref, x_ref, wf_ref, w_ref, b_ref, out_ref):
    """One grid step = one block of GB graphs (NB nodes), fully in VMEM.

    a_ref : (NB, NB)      bf16 diagonal block of batched (A + I)      (eps = 0 GIN)
    x_ref : (NB, DIN)     bf16 node features
    wf_ref: (DIN, HID)    bf16 first-layer w1 (contraction dim = 128)
    w_ref : (8, HID, HID) bf16 slab: [l0.w2, l1.w1, l1.w2, l2.w1, l2.w2, l3.w1, l3.w2, Wp^T]
                          (resident across grid; last-layer w2 / Wp^T zero-padded in lanes)
    b_ref : (8, HID)      f32 bias slab (resident across grid)
    out_ref: (GB, 2*HID)  lanes 0:HID -> y (valid 0:DOUT), lanes HID:2*HID -> scores (valid 0:K)
    """
    a = a_ref[...]                  # bf16
    h = x_ref[...]                  # bf16 for layer 0, f32 afterwards

    for l in range(NUM_LAYERS):
        # GIN aggregation on the MXU: (A + I) @ h, bf16 operands, f32 accumulation.
        agg = jnp.dot(a, h.astype(jnp.bfloat16), preferred_element_type=jnp.float32)
        w1 = wf_ref[...] if l == 0 else w_ref[2 * l - 1]     # real contraction dims
        w2 = w_ref[2 * l]
        b1 = b_ref[pl.ds(2 * l, 1), :]                       # (1, HID) row broadcast
        b2 = b_ref[pl.ds(2 * l + 1, 1), :]
        # 2-layer MLP with ReLU (InfoGraph-style GINConv nn); zero-padded lanes of the
        # last layer's w2/b2 stay exactly zero through ReLU.
        h = jnp.maximum(
            jnp.dot(agg.astype(jnp.bfloat16), w1, preferred_element_type=jnp.float32) + b1, 0.0)
        h = jnp.maximum(
            jnp.dot(h.astype(jnp.bfloat16), w2, preferred_element_type=jnp.float32) + b2, 0.0)

    # Graph readout (sum pool) as a VPU/sublane reduction instead of a pool matmul.
    y = jnp.sum(h.reshape(GB, NPG, HID), axis=1)              # (GB, HID) f32, valid 0:DOUT

    # prototypes: nn.Linear(DOUT, K, bias=False); Wp^T pre-transposed/zero-padded into the
    # slab by the wrapper (rows DOUT:HID are zero and y's lanes DOUT:HID are exactly zero).
    s = jnp.dot(y.astype(jnp.bfloat16), w_ref[N_SLAB - 1],
                preferred_element_type=jnp.float32)           # (GB, HID), valid 0:K

    # Fused lane-dense output slab: one 128-lane row per graph, one writeback DMA per step.
    out_ref[:, pl.ds(0, HID)] = y
    out_ref[:, pl.ds(HID, HID)] = s


def pack_params(layer_params, proto_w):
    """Pack all tiny parameters into small resident slabs (trace-time, outside kernel)."""
    w_first = jnp.zeros((DIN, HID), jnp.float32)
    w_slab = jnp.zeros((N_SLAB, HID, HID), jnp.float32)
    b_slab = jnp.zeros((2 * NUM_LAYERS, HID), jnp.float32)
    for l, (w1, b1, w2, b2) in enumerate(layer_params):
        if l == 0:
            w_first = w1                                                    # (DIN, HID)
        else:
            w_slab = w_slab.at[2 * l - 1, :w1.shape[0], :w1.shape[1]].set(w1)
        w_slab = w_slab.at[2 * l, :w2.shape[0], :w2.shape[1]].set(w2)
        b_slab = b_slab.at[2 * l, :b1.shape[-1]].set(b1.reshape(-1))
        b_slab = b_slab.at[2 * l + 1, :b2.shape[-1]].set(b2.reshape(-1))
    # Pre-transpose the prototype weight here (free at trace time) -> (DOUT, K).
    w_slab = w_slab.at[N_SLAB - 1, :DOUT, :K].set(proto_w.T)
    # Weights travel as bf16 (MXU operands); biases stay f32 (added to the f32 accumulator).
    return w_first.astype(jnp.bfloat16), w_slab.astype(jnp.bfloat16), b_slab


def pgcl_forward(adj_blocks, x, layer_params, proto_w):
    """adj_blocks: (NUM_BLOCKS, NB, NB) contiguous diagonal blocks of the batched (A+I)."""
    w_first, w_slab, b_slab = pack_params(layer_params, proto_w)
    num_blocks = adj_blocks.shape[0]
    num_graphs = num_blocks * GB

    a_bf = adj_blocks.astype(jnp.bfloat16)   # 0/1/2 entries: exact in bf16
    x_bf = x.astype(jnp.bfloat16)

    flops_per_block = (
        2 * NB * NB * DIN + 2 * NB * DIN * HID + 2 * NB * HID * HID        # layer 0
        + (NUM_LAYERS - 1) * (2 * NB * NB * HID + 4 * NB * HID * HID)      # layers 1..3
        + 2 * GB * HID * HID                                               # prototypes
        + NB * HID)                                                        # readout
    bytes_accessed = (2 * (num_blocks * NB * NB + num_blocks * NB * DIN
                           + DIN * HID + N_SLAB * HID * HID)               # bf16 inputs
                      + 4 * (2 * NUM_LAYERS * HID + num_graphs * OUT_W))   # f32 bias + out

    out = pl.pallas_call(
        pgcl_kernel,
        out_shape=jax.ShapeDtypeStruct((num_graphs, OUT_W), jnp.float32),
        grid_spec=pltpu.PrefetchScalarGridSpec(
            num_scalar_prefetch=0,
            grid=(num_blocks,),
            in_specs=[
                # Contiguous, pre-extracted diagonal adjacency blocks (leading dim squeezed).
                pl.BlockSpec((None, NB, NB), lambda i: (i, 0, 0)),
                pl.BlockSpec((NB, DIN), lambda i: (i, 0)),
                # Parameter slabs: constant block index -> DMA'd once, resident across grid.
                pl.BlockSpec((DIN, HID), lambda i: (0, 0)),
                pl.BlockSpec((N_SLAB, HID, HID), lambda i: (0, 0, 0)),
                pl.BlockSpec((2 * NUM_LAYERS, HID), lambda i: (0, 0)),
            ],
            out_specs=pl.BlockSpec((GB, OUT_W), lambda i: (i, 0)),
        ),
        compiler_params=pltpu.CompilerParams(
            dimension_semantics=("parallel",)),   # v7x: 2 TCs split the graph blocks
        cost_estimate=pl.CostEstimate(
            flops=int(num_blocks * flops_per_block),
            transcendentals=0,
            bytes_accessed=int(bytes_accessed)),
    )(a_bf, x_bf, w_first, w_slab, b_slab)

    y = out[:, :DOUT]
    scores = out[:, HID:HID + K]
    return y, scores


def pgcl_reference(adj_full, x, layer_params, proto_w):
    """Pure-JAX reference with the same numerics (bf16 MXU operands, f32 accumulation)."""
    bf = lambda t: t.astype(jnp.bfloat16)
    h = x
    for (w1, b1, w2, b2) in layer_params:
        agg = jnp.dot(bf(adj_full), bf(h), preferred_element_type=jnp.float32)
        h = jnp.maximum(jnp.dot(bf(agg), bf(w1), preferred_element_type=jnp.float32) + b1, 0.0)
        h = jnp.maximum(jnp.dot(bf(h), bf(w2), preferred_element_type=jnp.float32) + b2, 0.0)
    y = h.reshape(G, NPG, -1).sum(axis=1)
    s = jnp.dot(bf(y), bf(proto_w.T), preferred_element_type=jnp.float32)
    return y, s


def make_params(key):
    layer_params = []
    d_in = DIN
    for l in range(NUM_LAYERS):
        d_out = DOUT if l == NUM_LAYERS - 1 else HID
        key, k1, k2, k3, k4 = jax.random.split(key, 5)
        w1 = 0.1 * jax.random.normal(k1, (d_in, HID), jnp.float32)
        b1 = 0.1 * jax.random.normal(k2, (1, HID), jnp.float32)
        w2 = 0.1 * jax.random.normal(k3, (HID, d_out), jnp.float32)
        b2 = 0.1 * jax.random.normal(k4, (1, d_out), jnp.float32)
        layer_params.append((w1, b1, w2, b2))
        d_in = d_out
    key, kp = jax.random.split(key)
    proto_w = 0.1 * jax.random.normal(kp, (K, DOUT), jnp.float32)  # nn.Linear (K, DOUT) layout
    return layer_params, proto_w


def make_graph_batch(key):
    # G ring graphs of NPG nodes each; (A + I) with eps = 0 GIN self loops.
    eye_npg = jnp.eye(NPG, dtype=jnp.float32)
    ring = jnp.roll(eye_npg, 1, axis=1) + jnp.roll(eye_npg, -1, axis=1)
    per_graph = ring + eye_npg
    # Contiguous diagonal blocks of the batched adjacency, one per grid step.
    blk = jnp.kron(jnp.eye(GB, dtype=jnp.float32), per_graph)        # (NB, NB)
    adj_blocks = jnp.tile(blk[None], (NUM_BLOCKS, 1, 1))             # (NUM_BLOCKS, NB, NB)
    # Full block-diagonal adjacency only for the pure-JAX reference.
    adj_full = jnp.kron(jnp.eye(G, dtype=jnp.float32), per_graph)    # (N, N)
    x = jax.random.normal(key, (N, DIN), jnp.float32)                # node features g.ndata['attr']
    return adj_blocks, adj_full, x


if __name__ == "__main__":
    key = jax.random.PRNGKey(0)
    k_feat, k_param = jax.random.split(key)

    adj_blocks, adj_full, x = make_graph_batch(k_feat)
    layer_params, proto_w = make_params(k_param)

    y, scores = pgcl_forward(adj_blocks, x, layer_params, proto_w)
    jax.block_until_ready((y, scores))

    y_ref, s_ref = pgcl_reference(adj_full, x, layer_params, proto_w)
    assert y.shape == (G, DOUT) and scores.shape == (G, K)
    assert jnp.allclose(y, y_ref, atol=5e-3, rtol=5e-3)
    assert jnp.allclose(scores, s_ref, atol=5e-3, rtol=5e-3)

    print("KERNEL_OK")
</pallas_src>

<mosaic_0001>
module attributes {stable_mosaic.version = 11 : i64} {
  func.func @pgcl_kernel(%arg0: i32, %arg1: memref<1x128x128xbf16, #tpu.memory_space<vmem>>, %arg2: memref<128x128xbf16, #tpu.memory_space<vmem>>, %arg3: memref<128x64xbf16, #tpu.memory_space<vmem>>, %arg4: memref<8x64x64xbf16, #tpu.memory_space<vmem>>, %arg5: memref<8x64xf32, #tpu.memory_space<vmem>>, %arg6: memref<16x128xf32, #tpu.memory_space<vmem>>) attributes {dimension_semantics = [#tpu.dimension_semantics<parallel>], iteration_bounds = array<i64: 4>, scalar_prefetch = 0 : i64, scratch_operands = 0 : i64, tpu.core_type = #tpu.core_type<tc>, window_params = [{transform_indices = @transform_0, window_bounds = array<i64: 1, 128, 128>}, {transform_indices = @transform_1, window_bounds = array<i64: 128, 128>}, {pipeline_mode = #tpu.pipeline_mode<synchronous>, transform_indices = @transform_2, window_bounds = array<i64: 128, 64>}, {pipeline_mode = #tpu.pipeline_mode<synchronous>, transform_indices = @transform_3, window_bounds = array<i64: 8, 64, 64>}, {pipeline_mode = #tpu.pipeline_mode<synchronous>, transform_indices = @transform_4, window_bounds = array<i64: 8, 64>}, {transform_indices = @transform_5, window_bounds = array<i64: 16, 128>}]} {
    %c0 = arith.constant 0 : index
    %c0_0 = arith.constant 0 : index
    %c0_1 = arith.constant 0 : index
    %0 = vector.load %arg1[%c0, %c0_0, %c0_1] : memref<1x128x128xbf16, #tpu.memory_space<vmem>>, vector<1x128x128xbf16>
    %1 = vector.shape_cast %0 : vector<1x128x128xbf16> to vector<128x128xbf16>
    %c0_2 = arith.constant 0 : index
    %c0_3 = arith.constant 0 : index
    %2 = vector.load %arg2[%c0_2, %c0_3] : memref<128x128xbf16, #tpu.memory_space<vmem>>, vector<128x128xbf16>
    %cst = arith.constant dense<0.000000e+00> : vector<128x128xf32>
    %3 = tpu.matmul %1, %2, %cst {dimension_numbers = #tpu.dot_dimension_numbers<[1], [0], [0], [1], [0, 0, 1, 1], [], []>} : vector<128x128xbf16>, vector<128x128xbf16>, vector<128x128xf32> -> vector<128x128xf32>
    %c0_4 = arith.constant 0 : index
    %c0_5 = arith.constant 0 : index
    %4 = vector.load %arg3[%c0_4, %c0_5] : memref<128x64xbf16, #tpu.memory_space<vmem>>, vector<128x64xbf16>
    %c0_6 = arith.constant 0 : index
    %c0_7 = arith.constant 0 : index
    %c0_8 = arith.constant 0 : index
    %5 = vector.load %arg4[%c0_6, %c0_7, %c0_8] : memref<8x64x64xbf16, #tpu.memory_space<vmem>>, vector<1x64x64xbf16>
    %6 = vector.shape_cast %5 : vector<1x64x64xbf16> to vector<64x64xbf16>
    %c0_9 = arith.constant 0 : index
    %c0_10 = arith.constant 0 : index
    %7 = vector.load %arg5[%c0_9, %c0_10] : memref<8x64xf32, #tpu.memory_space<vmem>>, vector<1x64xf32>
    %c1 = arith.constant 1 : index
    %c0_11 = arith.constant 0 : index
    %8 = vector.load %arg5[%c1, %c0_11] : memref<8x64xf32, #tpu.memory_space<vmem>>, vector<1x64xf32>
    %9 = arith.truncf %3 : vector<128x128xf32> to vector<128x128xbf16>
    %cst_12 = arith.constant dense<0.000000e+00> : vector<128x64xf32>
    %10 = tpu.matmul %9, %4, %cst_12 {dimension_numbers = #tpu.dot_dimension_numbers<[1], [0], [0], [1], [0, 0, 1, 1], [], []>} : vector<128x128xbf16>, vector<128x64xbf16>, vector<128x64xf32> -> vector<128x64xf32>
    %11 = vector.broadcast %7 : vector<1x64xf32> to vector<128x64xf32>
    %12 = arith.addf %10, %11 : vector<128x64xf32>
    %cst_13 = arith.constant 0.000000e+00 : f32
    %13 = vector.broadcast %cst_13 : f32 to vector<128x64xf32>
    %14 = arith.maximumf %12, %13 : vector<128x64xf32>
    %15 = arith.truncf %14 : vector<128x64xf32> to vector<128x64xbf16>
    %cst_14 = arith.constant dense<0.000000e+00> : vector<128x64xf32>
    %16 = tpu.matmul %15, %6, %cst_14 {dimension_numbers = #tpu.dot_dimension_numbers<[1], [0], [0], [1], [0, 0, 1, 1], [], []>} : vector<128x64xbf16>, vector<64x64xbf16>, vector<128x64xf32> -> vector<128x64xf32>
    %17 = vector.broadcast %8 : vector<1x64xf32> to vector<128x64xf32>
    %18 = arith.addf %16, %17 : vector<128x64xf32>
    %cst_15 = arith.constant 0.000000e+00 : f32
    %19 = vector.broadcast %cst_15 : f32 to vector<128x64xf32>
    %20 = arith.maximumf %18, %19 : vector<128x64xf32>
    %21 = arith.truncf %20 : vector<128x64xf32> to vector<128x64xbf16>
    %cst_16 = arith.constant dense<0.000000e+00> : vector<128x64xf32>
    %22 = tpu.matmul %1, %21, %cst_16 {dimension_numbers = #tpu.dot_dimension_numbers<[1], [0], [0], [1], [0, 0, 1, 1], [], []>} : vector<128x128xbf16>, vector<128x64xbf16>, vector<128x64xf32> -> vector<128x64xf32>
    %c1_17 = arith.constant 1 : index
    %c0_18 = arith.constant 0 : index
    %c0_19 = arith.constant 0 : index
    %23 = vector.load %arg4[%c1_17, %c0_18, %c0_19] : memref<8x64x64xbf16, #tpu.memory_space<vmem>>, vector<1x64x64xbf16>
    %24 = vector.shape_cast %23 : vector<1x64x64xbf16> to vector<64x64xbf16>
    %c2 = arith.constant 2 : index
    %c0_20 = arith.constant 0 : index
    %c0_21 = arith.constant 0 : index
    %25 = vector.load %arg4[%c2, %c0_20, %c0_21] : memref<8x64x64xbf16, #tpu.memory_space<vmem>>, vector<1x64x64xbf16>
    %26 = vector.shape_cast %25 : vector<1x64x64xbf16> to vector<64x64xbf16>
    %c2_22 = arith.constant 2 : index
    %c0_23 = arith.constant 0 : index
    %27 = vector.load %arg5[%c2_22, %c0_23] : memref<8x64xf32, #tpu.memory_space<vmem>>, vector<1x64xf32>
    %c3 = arith.constant 3 : index
    %c0_24 = arith.constant 0 : index
    %28 = vector.load %arg5[%c3, %c0_24] : memref<8x64xf32, #tpu.memory_space<vmem>>, vector<1x64xf32>
    %29 = arith.truncf %22 : vector<128x64xf32> to vector<128x64xbf16>
    %cst_25 = arith.constant dense<0.000000e+00> : vector<128x64xf32>
    %30 = tpu.matmul %29, %24, %cst_25 {dimension_numbers = #tpu.dot_dimension_numbers<[1], [0], [0], [1], [0, 0, 1, 1], [], []>} : vector<128x64xbf16>, vector<64x64xbf16>, vector<128x64xf32> -> vector<128x64xf32>
    %31 = vector.broadcast %27 : vector<1x64xf32> to vector<128x64xf32>
    %32 = arith.addf %30, %31 : vector<128x64xf32>
    %cst_26 = arith.constant 0.000000e+00 : f32
    %33 = vector.broadcast %cst_26 : f32 to vector<128x64xf32>
    %34 = arith.maximumf %32, %33 : vector<128x64xf32>
    %35 = arith.truncf %34 : vector<128x64xf32> to vector<128x64xbf16>
    %cst_27 = arith.constant dense<0.000000e+00> : vector<128x64xf32>
    %36 = tpu.matmul %35, %26, %cst_27 {dimension_numbers = #tpu.dot_dimension_numbers<[1], [0], [0], [1], [0, 0, 1, 1], [], []>} : vector<128x64xbf16>, vector<64x64xbf16>, vector<128x64xf32> -> vector<128x64xf32>
    %37 = vector.broadcast %28 : vector<1x64xf32> to vector<128x64xf32>
    %38 = arith.addf %36, %37 : vector<128x64xf32>
    %cst_28 = arith.constant 0.000000e+00 : f32
    %39 = vector.broadcast %cst_28 : f32 to vector<128x64xf32>
    %40 = arith.maximumf %38, %39 : vector<128x64xf32>
    %41 = arith.truncf %40 : vector<128x64xf32> to vector<128x64xbf16>
    %cst_29 = arith.constant dense<0.000000e+00> : vector<128x64xf32>
    %42 = tpu.matmul %1, %41, %cst_29 {dimension_numbers = #tpu.dot_dimension_numbers<[1], [0], [0], [1], [0, 0, 1, 1], [], []>} : vector<128x128xbf16>, vector<128x64xbf16>, vector<128x64xf32> -> vector<128x64xf32>
    %c3_30 = arith.constant 3 : index
    %c0_31 = arith.constant 0 : index
    %c0_32 = arith.constant 0 : index
    %43 = vector.load %arg4[%c3_30, %c0_31, %c0_32] : memref<8x64x64xbf16, #tpu.memory_space<vmem>>, vector<1x64x64xbf16>
    %44 = vector.shape_cast %43 : vector<1x64x64xbf16> to vector<64x64xbf16>
    %c4 = arith.constant 4 : index
    %c0_33 = arith.constant 0 : index
    %c0_34 = arith.constant 0 : index
    %45 = vector.load %arg4[%c4, %c0_33, %c0_34] : memref<8x64x64xbf16, #tpu.memory_space<vmem>>, vector<1x64x64xbf16>
    %46 = vector.shape_cast %45 : vector<1x64x64xbf16> to vector<64x64xbf16>
    %c4_35 = arith.constant 4 : index
    %c0_36 = arith.constant 0 : index
    %47 = vector.load %arg5[%c4_35, %c0_36] : memref<8x64xf32, #tpu.memory_space<vmem>>, vector<1x64xf32>
    %c5 = arith.constant 5 : index
    %c0_37 = arith.constant 0 : index
    %48 = vector.load %arg5[%c5, %c0_37] : memref<8x64xf32, #tpu.memory_space<vmem>>, vector<1x64xf32>
    %49 = arith.truncf %42 : vector<128x64xf32> to vector<128x64xbf16>
    %cst_38 = arith.constant dense<0.000000e+00> : vector<128x64xf32>
    %50 = tpu.matmul %49, %44, %cst_38 {dimension_numbers = #tpu.dot_dimension_numbers<[1], [0], [0], [1], [0, 0, 1, 1], [], []>} : vector<128x64xbf16>, vector<64x64xbf16>, vector<128x64xf32> -> vector<128x64xf32>
    %51 = vector.broadcast %47 : vector<1x64xf32> to vector<128x64xf32>
    %52 = arith.addf %50, %51 : vector<128x64xf32>
    %cst_39 = arith.constant 0.000000e+00 : f32
    %53 = vector.broadcast %cst_39 : f32 to vector<128x64xf32>
    %54 = arith.maximumf %52, %53 : vector<128x64xf32>
    %55 = arith.truncf %54 : vector<128x64xf32> to vector<128x64xbf16>
    %cst_40 = arith.constant dense<0.000000e+00> : vector<128x64xf32>
    %56 = tpu.matmul %55, %46, %cst_40 {dimension_numbers = #tpu.dot_dimension_numbers<[1], [0], [0], [1], [0, 0, 1, 1], [], []>} : vector<128x64xbf16>, vector<64x64xbf16>, vector<128x64xf32> -> vector<128x64xf32>
    %57 = vector.broadcast %48 : vector<1x64xf32> to vector<128x64xf32>
    %58 = arith.addf %56, %57 : vector<128x64xf32>
    %cst_41 = arith.constant 0.000000e+00 : f32
    %59 = vector.broadcast %cst_41 : f32 to vector<128x64xf32>
    %60 = arith.maximumf %58, %59 : vector<128x64xf32>
    %61 = arith.truncf %60 : vector<128x64xf32> to vector<128x64xbf16>
    %cst_42 = arith.constant dense<0.000000e+00> : vector<128x64xf32>
    %62 = tpu.matmul %1, %61, %cst_42 {dimension_numbers = #tpu.dot_dimension_numbers<[1], [0], [0], [1], [0, 0, 1, 1], [], []>} : vector<128x128xbf16>, vector<128x64xbf16>, vector<128x64xf32> -> vector<128x64xf32>
    %c5_43 = arith.constant 5 : index
    %c0_44 = arith.constant 0 : index
    %c0_45 = arith.constant 0 : index
    %63 = vector.load %arg4[%c5_43, %c0_44, %c0_45] : memref<8x64x64xbf16, #tpu.memory_space<vmem>>, vector<1x64x64xbf16>
    %64 = vector.shape_cast %63 : vector<1x64x64xbf16> to vector<64x64xbf16>
    %c6 = arith.constant 6 : index
    %c0_46 = arith.constant 0 : index
    %c0_47 = arith.constant 0 : index
    %65 = vector.load %arg4[%c6, %c0_46, %c0_47] : memref<8x64x64xbf16, #tpu.memory_space<vmem>>, vector<1x64x64xbf16>
    %66 = vector.shape_cast %65 : vector<1x64x64xbf16> to vector<64x64xbf16>
    %c6_48 = arith.constant 6 : index
    %c0_49 = arith.constant 0 : index
    %67 = vector.load %arg5[%c6_48, %c0_49] : memref<8x64xf32, #tpu.memory_space<vmem>>, vector<1x64xf32>
    %c7 = arith.constant 7 : index
    %c0_50 = arith.constant 0 : index
    %68 = vector.load %arg5[%c7, %c0_50] : memref<8x64xf32, #tpu.memory_space<vmem>>, vector<1x64xf32>
    %69 = arith.truncf %62 : vector<128x64xf32> to vector<128x64xbf16>
    %cst_51 = arith.constant dense<0.000000e+00> : vector<128x64xf32>
    %70 = tpu.matmul %69, %64, %cst_51 {dimension_numbers = #tpu.dot_dimension_numbers<[1], [0], [0], [1], [0, 0, 1, 1], [], []>} : vector<128x64xbf16>, vector<64x64xbf16>, vector<128x64xf32> -> vector<128x64xf32>
    %71 = vector.broadcast %67 : vector<1x64xf32> to vector<128x64xf32>
    %72 = arith.addf %70, %71 : vector<128x64xf32>
    %cst_52 = arith.constant 0.000000e+00 : f32
    %73 = vector.broadcast %cst_52 : f32 to vector<128x64xf32>
    %74 = arith.maximumf %72, %73 : vector<128x64xf32>
    %75 = arith.truncf %74 : vector<128x64xf32> to vector<128x64xbf16>
    %cst_53 = arith.constant dense<0.000000e+00> : vector<128x64xf32>
    %76 = tpu.matmul %75, %66, %cst_53 {dimension_numbers = #tpu.dot_dimension_numbers<[1], [0], [0], [1], [0, 0, 1, 1], [], []>} : vector<128x64xbf16>, vector<64x64xbf16>, vector<128x64xf32> -> vector<128x64xf32>
    %77 = vector.broadcast %68 : vector<1x64xf32> to vector<128x64xf32>
    %78 = arith.addf %76, %77 : vector<128x64xf32>
    %cst_54 = arith.constant 0.000000e+00 : f32
    %79 = vector.broadcast %cst_54 : f32 to vector<128x64xf32>
    %80 = arith.maximumf %78, %79 : vector<128x64xf32>
    %81 = vector.shape_cast %80 : vector<128x64xf32> to vector<16x8x64xf32>
    %cst_55 = arith.constant dense<0.000000e+00> : vector<16x64xf32>
    %82 = vector.multi_reduction <add>, %81, %cst_55 [1] : vector<16x8x64xf32> to vector<16x64xf32>
    %83 = arith.truncf %82 : vector<16x64xf32> to vector<16x64xbf16>
    %c7_56 = arith.constant 7 : index
    %c0_57 = arith.constant 0 : index
    %c0_58 = arith.constant 0 : index
    %84 = vector.load %arg4[%c7_56, %c0_57, %c0_58] : memref<8x64x64xbf16, #tpu.memory_space<vmem>>, vector<1x64x64xbf16>
    %85 = vector.shape_cast %84 : vector<1x64x64xbf16> to vector<64x64xbf16>
    %cst_59 = arith.constant dense<0.000000e+00> : vector<16x64xf32>
    %86 = tpu.matmul %83, %85, %cst_59 {dimension_numbers = #tpu.dot_dimension_numbers<[1], [0], [0], [1], [0, 0, 1, 1], [], []>} : vector<16x64xbf16>, vector<64x64xbf16>, vector<16x64xf32> -> vector<16x64xf32>
    %c0_60 = arith.constant 0 : index
    %c0_61 = arith.constant 0 : index
    %87 = vector.load %arg6[%c0_60, %c0_61] : memref<16x128xf32, #tpu.memory_space<vmem>>, vector<16x64xf32>
    tpu.vector_store %arg6[%c0_60, %c0_61], %82 {strides = array<i32>} : memref<16x128xf32, #tpu.memory_space<vmem>>, vector<16x64xf32>,
    %c0_62 = arith.constant 0 : index
    %c64 = arith.constant 64 : index
    %88 = vector.load %arg6[%c0_62, %c64] : memref<16x128xf32, #tpu.memory_space<vmem>>, vector<16x64xf32>
    tpu.vector_store %arg6[%c0_62, %c64], %86 {strides = array<i32>} : memref<16x128xf32, #tpu.memory_space<vmem>>, vector<16x64xf32>,
    return
  }
  func.func @transform_0(%arg0: i32) -> (i32, i32, i32) {
    %c0_i32 = arith.constant 0 : i32
    %c0_i32_0 = arith.constant 0 : i32
    %c0_i32_1 = arith.constant 0 : i32
    return %arg0, %c0_i32, %c0_i32_0 : i32, i32, i32
  }
  func.func @transform_1(%arg0: i32) -> (i32, i32) {
    %c0_i32 = arith.constant 0 : i32
    %c0_i32_0 = arith.constant 0 : i32
    return %arg0, %c0_i32 : i32, i32
  }
  func.func @transform_2(%arg0: i32) -> (i32, i32) {
    %c0_i32 = arith.constant 0 : i32
    %c0_i32_0 = arith.constant 0 : i32
    %c0_i32_1 = arith.constant 0 : i32
    return %c0_i32, %c0_i32_0 : i32, i32
  }
  func.func @transform_3(%arg0: i32) -> (i32, i32, i32) {
    %c0_i32 = arith.constant 0 : i32
    %c0_i32_0 = arith.constant 0 : i32
    %c0_i32_1 = arith.constant 0 : i32
    %c0_i32_2 = arith.constant 0 : i32
    return %c0_i32, %c0_i32_0, %c0_i32_1 : i32, i32, i32
  }
  func.func @transform_4(%arg0: i32) -> (i32, i32) {
    %c0_i32 = arith.constant 0 : i32
    %c0_i32_0 = arith.constant 0 : i32
    %c0_i32_1 = arith.constant 0 : i32
    return %c0_i32, %c0_i32_0 : i32, i32
  }
  func.func @transform_5(%arg0: i32) -> (i32, i32) {
    %c0_i32 = arith.constant 0 : i32
    %c0_i32_0 = arith.constant 0 : i32
    return %arg0, %c0_i32 : i32, i32
  }
}

</mosaic_0001>

<bundles_post_ra>
// kernel: tpu_custom_call.1
= control target key start
LH: loop header
LB: loop body
LE: loop exit
PB: predicated region body
PF: predicated region fallthrough
CT: control target
= control target key end

     0   :  { %s3186_s0 = inlined_call_operand.hbm [shape: bf16[4,128,128], index: 0, kind: input, shape index: {}]   ;;  %s3187_s1 = inlined_call_operand.hbm [shape: bf16[512,128], index: 1, kind: input, shape index: {}]   ;;  %s3188_s2 = inlined_call_operand.vmem [shape: bf16[128,64], index: 2, kind: input, shape index: {}]   ;;  %s3189_s3 = inlined_call_operand.hbm [shape: bf16[8,64,64], index: 3, kind: input, shape index: {}]   ;;  %s3190_s4 = inlined_call_operand.vmem [shape: f32[8,64], index: 4, kind: input, shape index: {}]   ;;  %s3191_s5 = inlined_call_operand.hbm [shape: f32[64,128], index: 5, kind: output, shape index: {}]  }
   0x1   :  { %3196 = sst [smem:[#allocation14_spill]] %s3186_s0 }
   0x2   :  { %3197 = sst [smem:[#allocation15_spill]] %s3189_s3 }
   0x3   :  { %10 = vsyncpa [#allocation3], 0 }
   0x4   :  { %12 = vsyncpa [#allocation3 + $0x1], 0 }
   0x5   :  { %13 = vsyncpa [#allocation6], 0 }
   0x6   :  { %15 = vsyncpa [#allocation6 + $0x1], 0 }
   0x7   :  { %16 = vsyncpa [#allocation4], 0 }
   0x8   :  { %18 = vsyncpa [#allocation4 + $0x1], 0  ;;  %s2760_s18 = smov 0   ;;  %s2762_s19 = smov 0  }
   0x9   :  { %s2764_s20 = smov 0   ;;  %s2766_s21 = smov 0  }
   0xa LB: > { %s2781_s22 = sadd.s32 4294967295, %s2722_s21   ;;  %s2115_s23 = sadd.s32 4294967294, %s2722_s21   ;;  %s2722_s21 = sphi %s2766_s21, %s3212_s21   ;;  %s2718_s20 = sphi %s2764_s20, %s3211_s20   ;;  %s2714_s19 = sphi %s2762_s19, %s3210_s19   ;;  %s2710_s18 = sphi %s2760_s18, %s3209_s18  }
   0xb   : > { %p44_p0 = scmp.ne.s32.totalorder %s2714_s19, %s2710_s18  ;;  %p45_p1 = scmp.eq.s32.totalorder %s2781_s22, 0 }
   0xc   : > { %p157_p2 = scmp.eq.s32.totalorder %s2781_s22, 3  ;;  %p163_p3 = scmp.eq.s32.totalorder %s2115_s23, 3 }
   0xd   : > { %p2790_p4 = por %p45_p1, %p44_p0  ;;  %p2116_p5 = scmp.ge.s32.totalorder %s2722_s21, 1 }
   0xe   : > { %p2795_p6 = por %p163_p3, %p44_p0  ;;  %p170_p7 = scmp.lt.s32.totalorder %s2722_s21, 5 }
   0xf   : > { %s3200_s3 = sld [smem:[#allocation15_spill]]  ;;  %s2724_s30 = smov [#allocation7]  }
  0x10   : > { %p2803_p8 = pnand %p2116_p5, %p170_p7  ;;  %s186_s6 = sshll.u32 %s2724_s30, 4  ;;  %s187_s6 = int_to_ptr.vmem [resolvable:$true] %s186_s6 }
  0x11   : > { %s2812_s7 = sadd.s32 1, %s2722_s21   ;;  %s3192_s8 = smov 64  }
  0x12   : > { %p2485_p9 = pneg %p2803_p8  ;;  %s3194_s9 = smov 4  }
  0x13   : > { %s28_s10 = ssub.s32 %s2722_s21, %s2812_s7  ;;  %s31_s11 = sadd.s32 1, %s2718_s20 }
  0x14   : > { %p2486_p10 = pnand %p2485_p9, %p45_p1  ;;  %p29_p11 = scmp.eq.s32.totalorder %s28_s10, 0 }
  0x15   : > { %s184_s28 = sshll.u32 %s3200_s3, 4  ;;  %p38_p12 = scmp.ne.s32.totalorder %s2718_s20, %s2714_s19  ;;  %s185_s28 = int_to_ptr.hbm [resolvable:$true] %s184_s28 }
  0x16   : > { %2488 = dma.hbm_to_vmem [thread:$0]  (!%p2486_p10), %s185_s28, 4096, %s187_s6, [#allocation6], %s3192_s8, %s3192_s8, %s3194_s9  }
  0x17   : > { %p39_p13 = scmp.eq.s32.totalorder %s2722_s21, 0  ;;  %p2501_p0 = scmp.lt.s32.totalorder %s2722_s21, 4 }
  0x18   : > { %s2825_s12 = scalar_select %p29_p11, %s2718_s20, %s31_s11  }
  0x19   : > { %p40_p3 = por %p39_p13, %p38_p12  ;;  %p2829_p5 = por %p157_p2, %p38_p12 }
  0x1a   : > { %3202 = sst [smem:[#allocation13_spill]] %s2825_s12  ;;  %s203_s14 = sand.u32 1, %s2718_s20  }
  0x1b   : > { %s2416_s15 = sshll.u32 %s2722_s21, 6  ;;  %s2119_s16 = sshll.u32 %s203_s14, 6 }
  0x1c   : > { %s3204_s0 = sld [smem:[#allocation14_spill]]  ;;  %s207_s28 = scalar_lea.vmem [#allocation2], %s2119_s16 }
  0x1d   : > { %s215_s30 = sshll.u32 %s207_s28, 4  ;;  %p2840_p7 = pnand %p2501_p0, %p40_p3  ;;  %s216_s30 = int_to_ptr.vmem [resolvable:$true] %s215_s30 }
  0x1e   : > { %s234_s8 = scalar_lea.hbm %s3187_s1, %s2416_s15  ;;  %s229_s9 = scalar_lea.vmem [#allocation5], %s2119_s16 }
  0x1f   : > { %s2847_s3 = sshll.u32 %s229_s9, 4  ;;  %s235_s17 = sshll.u32 %s234_s8, 4  ;;  %s236_s17 = int_to_ptr.hbm [resolvable:$true] %s235_s17  ;;  %s238_s3 = int_to_ptr.vmem [resolvable:$true] %s2847_s3 }
  0x20   : > { %s204_s23 = scalar_lea.sflag [#allocation3], %s203_s14  ;;  %p2592_p9 = pneg %p2840_p7 }
  0x22   : > { %s212_s26 = scalar_lea.hbm %s3204_s0, %s2416_s15  ;;  %s2595_s11 = scalar_lea.hbm %s3204_s0, 256 }
  0x23   : > { %s213_s27 = sshll.u32 %s212_s26, 4  ;;  %s214_s27 = int_to_ptr.hbm [resolvable:$true] %s213_s27 }
  0x24   : > { %s2588_s26 = sshra.s32 %s214_s27, 4  ;;  %s2589_s26 = int_to_ptr.hbm [resolvable:$true] %s2588_s26 }
  0x25   : > { %s2590_s28 = scalar_lea.hbm %s2589_s26, 64  ;;  %p2596_p12 = scmp.lt.s32.totalorder %s2589_s26, %s3204_s0 }
  0x26   : > { %p2591_p2 = scmp.ne.s32.totalorder %s2589_s26, %s2590_s28  ;;  %p2597_p13 = scmp.lt.s32.totalorder %s2595_s11, %s2590_s28 }
  0x28   : > { %p2593_p10 = pnand %p2592_p9, %p2591_p2  ;;  %p2598_p0 = por %p2597_p13, %p2596_p12 }
  0x2a   : > { %p2594_p11 = pneg %p2593_p10 }
  0x2c   : > { %p2599_p3 = pnand %p2598_p0, %p2594_p11 }
  0x2e   : > { %2602 = shalt.err (!%p2599_p3)
}
  0x2f   : > { %s3206_s8 = smov 4   ;;  %s3207_s9 = smov 64  }
  0x30   : > { %2492 = dma.hbm_to_vmem [thread:$0]  (!%p2840_p7), %s214_s27, 1024, %s216_s30, %s204_s23, %s3207_s9, %s3207_s9, %s3206_s8  }
  0x31   : > { %s225_s12 = sand.u32 1, %s2722_s21   ;;  %s2618_s10 = sshra.s32 %s236_s17, 4  ;;  %s2619_s10 = int_to_ptr.hbm [resolvable:$true] %s2618_s10 }
  0x32   : > { %s226_s14 = scalar_lea.sflag [#allocation6], %s225_s12  ;;  %s2620_s26 = scalar_lea.hbm %s2619_s10, 64 }
  0x33   : > { %p2621_p2 = scmp.ne.s32.totalorder %s2619_s10, %s2620_s26  ;;  %s2625_s15 = scalar_lea.hbm %s3187_s1, 256 }
  0x34   : > { %p2626_p12 = scmp.lt.s32.totalorder %s2619_s10, %s3187_s1  ;;  %p2627_p13 = scmp.lt.s32.totalorder %s2625_s15, %s2620_s26 }
  0x35   : > { %p2623_p10 = pnand %p2621_p2, %p2592_p9 }
  0x36   : > { %p2628_p0 = por %p2627_p13, %p2626_p12 }
  0x37   : > { %p2624_p11 = pneg %p2623_p10 }
  0x39   : > { %p2629_p3 = pnand %p2628_p0, %p2624_p11 }
  0x3b   : > { %2632 = shalt.err (!%p2629_p3)
}
  0x3c   : > { %2495 = dma.hbm_to_vmem [thread:$0]  (!%p2840_p7), %s236_s17, 1024, %s238_s3, %s226_s14, %s3207_s9, %s3207_s9, %s3206_s8  }
  0x3d   : > { %249 = sbr.rel (%p2803_p8) target bundleno = 2622 (0xa3e), region = 40  ;;  %s2884_s27 = sand.u32 (!%p2803_p8), 1, %s2714_s19  }
  0x3e   : > { %s2126_s0 = sshll.u32 (!%p2803_p8), %s2884_s27, 6  ;;  %s252_s30 = scalar_lea.sflag (!%p2803_p8), [#allocation3], %s2884_s27 }
  0x3f   : > { %s2888_s23 = scalar_lea.vmem (!%p2803_p8), [#allocation2], %s2126_s0 }
  0x42   : > { %2693 = dma.done.wait (%p2790_p4), %s252_s30, 1024  }
  0x43   : > { %2695 = vsyncadd (%p2790_p4), %s252_s30, 4294966272  ;;  %s261_s3 = sand.u32 1, %s2781_s22   ;;  %s265_s6 = scalar_lea.vmem [#allocation5], %s2126_s0 }
  0x44   : > { %s262_s29 = scalar_lea.sflag [#allocation6], %s261_s3 }
  0x45   : > { %2697 = dma.done.wait (%p2790_p4), %s262_s29, 1024  }
  0x46   : > { %2699 = vsyncadd (%p2790_p4), %s262_s29, 4294966272 }
  0x47   : > { %2701 = dma.done.wait (%p45_p1), [#allocation6], 4096  }
  0x48   : > { %2703 = vsyncadd (%p45_p1), [#allocation6], 4294963200  ;;  %v2433_v0 = vld [vmem:[%s265_s6 + $0x38] sm:$0xff]  ;;  %v2432_v1 = vld [vmem:[%s265_s6 + $0x30] sm:$0xff]  ;;  %vm664_vm0 = vcmask 523264   ;;  %vm1886_vm1 = vcmask 1041409  }
  0x49   : > { %434 = vmatpush.bf16.msra.mxu0 %v2433_v0  ;;  %v2431_v2 = vld [vmem:[%s265_s6 + $0x28] sm:$0xff]  ;;  %v2430_v3 = vld [vmem:[%s265_s6 + $0x20] sm:$0xff]  ;;  %v2429_v4 = vld [vmem:[%s265_s6 + $0x18] sm:$0xff]  ;;  %vm1888_vm2 = vcmask 1042434   ;;  %vm1890_vm3 = vcmask 1043459   ;;  %vm1892_vm4 = vcmask 1044484  }
  0x4a   : > { %v2428_v5 = vld [vmem:[%s265_s6 + $0x10] sm:$0xff]  ;;  %v2427_v6 = vld [vmem:[%s265_s6 + $0x8] sm:$0xff]  ;;  %v2426_v7 = vld [vmem:[%s265_s6] sm:$0xff]  ;;  %vm1894_vm5 = vcmask 1045509   ;;  %vm1896_vm6 = vcmask 1046534   ;;  %s2129_s3 = sshll.u32 %s2884_s27, 4 }
  0x4b   : > { %v2904_v8 = vld [vmem:[%s2888_s23] sm:$0xff]  ;;  %v2908_v9 = vld [vmem:[%s2888_s23 + $0x8] sm:$0xff]  ;;  %v2912_v10 = vld [vmem:[%s2888_s23 + $0x10] sm:$0xff]  ;;  %vm1898_vm7 = vcmask 1047559   ;;  %s3110_s29 = scalar_lea.vmem [#allocation8], %s2129_s3  ;;  %s2727_s6 = smov 64  }
  0x4c   : > { %v2916_v11 = vld [vmem:[%s2888_s23 + $0x18] sm:$0xff]  ;;  %v2920_v12 = vld [vmem:[%s2888_s23 + $0x20] sm:$0xff]  ;;  %v2440_v14 = vld [vmem:[%s3188_s2 + $0x30] sm:$0xff]  ;;  %s2474_s24 = sshll.u32 %s2781_s22, 4  ;;  %vm1991_vm8 = vcmask 1048064   ;;  %s2007_s12 = sshll.u32 %s3110_s29, 4  ;;  %s2008_s12 = int_to_ptr.vmem [resolvable:$true] %s2007_s12 }
  0x4d   : > { %435 = vmatpush.bf16.msra.mxu0 %v2432_v1  ;;  %v2441_v13 = vld [vmem:[%s3188_s2 + $0x38] sm:$0xff]  ;;  %v2930_v15 = vld [vmem:[%s2888_s23 + $0x28] sm:$0xff]  ;;  %v2438_v17 = vld [vmem:[%s3188_s2 + $0x20] sm:$0xff]  ;;  %s2006_s9 = scalar_lea.hbm %s3191_s5, %s2474_s24  ;;  %s1995_s10 = scalar_lea.sflag [#allocation4], %s2884_s27 }
  0x4e   : > { %566 = vmatpush.bf16.msra.mxu1 %v2441_v13  ;;  %v2439_v16 = vld [vmem:[%s3188_s2 + $0x28] sm:$0xff]  ;;  %v2437_v18 = vld [vmem:[%s3188_s2 + $0x18] sm:$0xff]  ;;  %v2436_v19 = vld [vmem:[%s3188_s2 + $0x10] sm:$0xff]  ;;  %s2009_s14 = sshll.u32 %s2006_s9, 4  ;;  %s2668_s15 = scalar_lea.hbm %s3191_s5, 64  ;;  %s2010_s14 = int_to_ptr.hbm [resolvable:$true] %s2009_s14 }
  0x4f   : > { %v2946_v20 = vld [vmem:[%s2888_s23 + $0x30] sm:$0xff]  ;;  %v2435_v21 = vld [vmem:[%s3188_s2 + $0x8] sm:$0xff]  ;;  %v2434_v22 = vld [vmem:[%s3188_s2] sm:$0xff]  ;;  %s2662_s26 = sshra.s32 %s2010_s14, 4  ;;  %s2663_s26 = int_to_ptr.hbm [resolvable:$true] %s2662_s26 }
  0x50   : > { %v2956_v23 = vld [vmem:[%s2888_s23 + $0x38] sm:$0xff]  ;;  %v2444_v46 = vld [vmem:[#allocation7 + $0x10] sm:$0xff]  ;;  %v2443_v47 = vld [vmem:[#allocation7 + $0x8] sm:$0xff]  ;;  %s2664_s28 = scalar_lea.hbm %s2663_s26, 16  ;;  %p2669_p7 = scmp.lt.s32.totalorder %s2663_s26, %s3191_s5 }
  0x51   : > { %436 = vmatpush.bf16.msra.mxu0 %v2431_v2  ;;  %v2445_v43 = vld [vmem:[#allocation7 + $0x18] sm:$0xff]  ;;  %v2442_v49 = vld [vmem:[#allocation7] sm:$0xff]  ;;  %p2665_p1 = scmp.ne.s32.totalorder %s2663_s26, %s2664_s28  ;;  %p2670_p9 = scmp.lt.s32.totalorder %s2668_s15, %s2664_s28 }
  0x52   : > { %567 = vmatpush.bf16.msra.mxu1 %v2440_v14  ;;  %693 = vmatpush.bf16.msra.mxu2 %v2445_v43  ;;  %v2542_v53 = vld [vmem:[%s3190_s4] ss:$0 sm:$0xff] }
  0x53   : > { %p2666_p4 = pnand %p2665_p1, %p2829_p5  ;;  %p2671_p2 = por %p2670_p9, %p2669_p7 }
  0x55   : > { %437 = vmatpush.bf16.msra.mxu0 %v2430_v3  ;;  %p2667_p8 = pneg %p2666_p4 }
  0x56   : > { %568 = vmatpush.bf16.msra.mxu1 %v2439_v16  ;;  %694 = vmatpush.bf16.msra.mxu2 %v2444_v46 }
  0x57   : > { %p2672_p10 = pnand %p2671_p2, %p2667_p8 }
  0x59   : > { %438 = vmatpush.bf16.msra.mxu0 %v2429_v4 }
  0x5a   : > { %569 = vmatpush.bf16.msra.mxu1 %v2438_v17  ;;  %695 = vmatpush.bf16.msra.mxu2 %v2443_v47 }
  0x5d   : > { %439 = vmatpush.bf16.msra.mxu0 %v2428_v5 }
  0x5e   : > { %570 = vmatpush.bf16.msra.mxu1 %v2437_v18  ;;  %696 = vmatpush.bf16.msra.mxu2 %v2442_v49 }
  0x61   : > { %440 = vmatpush.bf16.msra.mxu0 %v2427_v6 }
  0x62   : > { %571 = vmatpush.bf16.msra.mxu1 %v2436_v19 }
  0x65   : > { %441 = vmatpush.bf16.msra.mxu0 %v2426_v7 }
  0x66   : > { %572 = vmatpush.bf16.msra.mxu1 %v2435_v21 }
  0x68   : > { %442 = vmatmul.bf16.vlgmr.msra.gmra.mxu0 %v2904_v8 }
  0x6a   : > { %573 = vmatpush.bf16.msra.mxu1 %v2434_v22 }
  0x78   : > { %447 = vmatmul.bf16.gmra.mxu0 %v2908_v9 }
  0x88   : > { %452 = vmatmul.bf16.gmra.mxu0 %v2912_v10 }
  0x98   : > { %457 = vmatmul.bf16.gmra.mxu0 %v2916_v11 }
  0xa8   : > { %462 = vmatmul.bf16.gmra.mxu0 %v2920_v12 }
  0xb8   : > { %467 = vmatmul.bf16.gmra.mxu0 %v2930_v15 }
  0xc8   : > { %472 = vmatmul.bf16.gmra.mxu0 %v2946_v20 }
  0xd8   : > { %477 = vmatmul.bf16.gmra.mxu0 %v2956_v23 }
  0xe5   : > { %v443_v24 = vpop.f32.mrf.mxu0 }
  0xed   : > { %v445_v25 = vpop.f32.mrf.mxu0 }
  0xee   : > { %v509_v26 = vpack.c.bf16 %v445_v25, %v443_v24 }
  0xf0   : > { %574 = vmatmul.bf16.vlgmr.msra.gmra.mxu1 %v509_v26 }
  0xf5   : > { %v448_v27 = vpop.f32.mrf.mxu0 }
  0xfd   : > { %v450_v28 = vpop.f32.mrf.mxu0 }
  0xfe   : > { %v510_v29 = vpack.c.bf16 %v450_v28, %v448_v27 }
 0x100   : > { %579 = vmatmul.bf16.gmra.mxu1 %v510_v29 }
 0x105   : > { %v453_v30 = vpop.f32.mrf.mxu0 }
 0x10d   : > { %v455_v31 = vpop.f32.mrf.mxu0 }
 0x10e   : > { %v511_v32 = vpack.c.bf16 %v455_v31, %v453_v30 }
 0x110   : > { %584 = vmatmul.bf16.gmra.mxu1 %v511_v32 }
 0x115   : > { %v458_v33 = vpop.f32.mrf.mxu0 }
 0x11d   : > { %v460_v34 = vpop.f32.mrf.mxu0 }
 0x11e   : > { %v512_v35 = vpack.c.bf16 %v460_v34, %v458_v33 }
 0x120   : > { %589 = vmatmul.bf16.gmra.mxu1 %v512_v35 }
 0x125   : > { %v463_v36 = vpop.f32.mrf.mxu0 }
 0x12d   : > { %v465_v37 = vpop.f32.mrf.mxu0 }
 0x12e   : > { %v513_v38 = vpack.c.bf16 %v465_v37, %v463_v36 }
 0x130   : > { %594 = vmatmul.bf16.gmra.mxu1 %v513_v38 }
 0x135   : > { %v468_v39 = vpop.f32.mrf.mxu0 }
 0x13d   : > { %v470_v40 = vpop.f32.mrf.mxu0 }
 0x13e   : > { %v514_v41 = vpack.c.bf16 %v470_v40, %v468_v39 }
 0x140   : > { %599 = vmatmul.bf16.gmra.mxu1 %v514_v41 }
 0x145   : > { %v473_v42 = vpop.f32.mrf.mxu0 }
 0x14d   : > { %v475_v44 = vpop.f32.mrf.mxu0 }
 0x14e   : > { %v515_v45 = vpack.c.bf16 %v475_v44, %v473_v42 }
 0x150   : > { %604 = vmatmul.bf16.gmra.mxu1 %v515_v45 }
 0x155   : > { %v478_v48 = vpop.f32.mrf.mxu0 }
 0x15d   : > { %v480_v50 = vpop.f32.mrf.mxu0 }
 0x15e   : > { %v516_v51 = vpack.c.bf16 %v480_v50, %v478_v48 }
 0x160   : > { %609 = vmatmul.bf16.gmra.mxu1 %v516_v51 }
 0x16d   : > { %v575_v52 = vpop.f32.mrf.mxu1 }
 0x16e   : > { %v576_v54 = vadd.f32 %v2542_v53, %v575_v52 }
 0x170   : > { %v615_v57 = vmax.f32 %v576_v54, 0.0 }
 0x175   : > { %v577_v55 = vpop.f32.mrf.mxu1 }
 0x176   : > { %v578_v56 = vadd.f32 %v2542_v53, %v577_v55 }
 0x178   : > { %v616_v58 = vmax.f32 %v578_v56, 0.0 }
 0x17a   : > { %v631_v59 = vpack.c.bf16 %v616_v58, %v615_v57 }
 0x17c   : > { %2242 = vmatmul.msk.bf16.vlgmr.msra.gmra.mxu2 %vm664_vm0, %v631_v59 }
 0x17d   : > { %v580_v60 = vpop.f32.mrf.mxu1 }
 0x17e   : > { %v581_v61 = vadd.f32 %v2542_v53, %v580_v60 }
 0x180   : > { %v617_v0 = vmax.f32 %v581_v61, 0.0 }
 0x185   : > { %v582_v62 = vpop.f32.mrf.mxu1 }
 0x186   : > { %v583_v63 = vadd.f32 %v2542_v53, %v582_v62 }
 0x188   : > { %v618_v1 = vmax.f32 %v583_v63, 0.0 }
 0x18a   : > { %v632_v2 = vpack.c.bf16 %v618_v1, %v617_v0 }
 0x18c   : > { %2243 = vmatmul.msk.bf16.gmra.mxu2 %vm664_vm0, %v632_v2 }
 0x18d   : > { %v585_v3 = vpop.f32.mrf.mxu1 }
 0x18e   : > { %v586_v4 = vadd.f32 %v2542_v53, %v585_v3 }
 0x190   : > { %v619_v7 = vmax.f32 %v586_v4, 0.0  ;;  %v2543_v4 = vld [vmem:[%s3190_s4 + $0x1] ss:$0 sm:$0xff] }
 0x195   : > { %v587_v5 = vpop.f32.mrf.mxu1 }
 0x196   : > { %v588_v6 = vadd.f32 %v2542_v53, %v587_v5 }
 0x198   : > { %v620_v13 = vmax.f32 %v588_v6, 0.0 }
 0x19a   : > { %v633_v14 = vpack.c.bf16 %v620_v13, %v619_v7 }
 0x19c   : > { %2244 = vmatmul.msk.bf16.gmra.mxu2 %vm664_vm0, %v633_v14 }
 0x19d   : > { %v590_v16 = vpop.f32.mrf.mxu1 }
 0x19e   : > { %v591_v17 = vadd.f32 %v2542_v53, %v590_v16 }
 0x1a0   : > { %v621_v21 = vmax.f32 %v591_v17, 0.0 }
 0x1a5   : > { %v592_v18 = vpop.f32.mrf.mxu1 }
 0x1a6   : > { %v593_v19 = vadd.f32 %v2542_v53, %v592_v18 }
 0x1a8   : > { %v622_v22 = vmax.f32 %v593_v19, 0.0 }
 0x1aa   : > { %v634_v24 = vpack.c.bf16 %v622_v22, %v621_v21 }
 0x1ac   : > { %2245 = vmatmul.msk.bf16.gmra.mxu2 %vm664_vm0, %v634_v24 }
 0x1ad   : > { %v595_v25 = vpop.f32.mrf.mxu1 }
 0x1ae   : > { %v596_v26 = vadd.f32 %v2542_v53, %v595_v25 }
 0x1b0   : > { %v623_v29 = vmax.f32 %v596_v26, 0.0 }
 0x1b5   : > { %v597_v27 = vpop.f32.mrf.mxu1 }
 0x1b6   : > { %v598_v28 = vadd.f32 %v2542_v53, %v597_v27 }
 0x1b8   : > { %v624_v30 = vmax.f32 %v598_v28, 0.0 }
 0x1ba   : > { %v635_v31 = vpack.c.bf16 %v624_v30, %v623_v29 }
 0x1bc   : > { %2246 = vmatmul.msk.bf16.gmra.mxu2 %vm664_vm0, %v635_v31 }
 0x1bd   : > { %v600_v32 = vpop.f32.mrf.mxu1 }
 0x1be   : > { %v601_v33 = vadd.f32 %v2542_v53, %v600_v32 }
 0x1c0   : > { %v625_v36 = vmax.f32 %v601_v33, 0.0 }
 0x1c5   : > { %v602_v34 = vpop.f32.mrf.mxu1 }
 0x1c6   : > { %v603_v35 = vadd.f32 %v2542_v53, %v602_v34 }
 0x1c8   : > { %v626_v37 = vmax.f32 %v603_v35, 0.0 }
 0x1ca   : > { %v636_v38 = vpack.c.bf16 %v626_v37, %v625_v36 }
 0x1cc   : > { %2247 = vmatmul.msk.bf16.gmra.mxu2 %vm664_vm0, %v636_v38 }
 0x1cd   : > { %v605_v39 = vpop.f32.mrf.mxu1 }
 0x1ce   : > { %v606_v40 = vadd.f32 %v2542_v53, %v605_v39 }
 0x1d0   : > { %v627_v43 = vmax.f32 %v606_v40, 0.0 }
 0x1d5   : > { %v607_v41 = vpop.f32.mrf.mxu1 }
 0x1d6   : > { %v608_v42 = vadd.f32 %v2542_v53, %v607_v41 }
 0x1d8   : > { %v628_v44 = vmax.f32 %v608_v42, 0.0 }
 0x1da   : > { %v637_v45 = vpack.c.bf16 %v628_v44, %v627_v43 }
 0x1dc   : > { %2248 = vmatmul.msk.bf16.gmra.mxu2 %vm664_vm0, %v637_v45 }
 0x1dd   : > { %v610_v46 = vpop.f32.mrf.mxu1 }
 0x1de   : > { %v611_v47 = vadd.f32 %v2542_v53, %v610_v46 }
 0x1e0   : > { %v629_v50 = vmax.f32 %v611_v47, 0.0 }
 0x1e5   : > { %v612_v48 = vpop.f32.mrf.mxu1 }
 0x1e6   : > { %v613_v49 = vadd.f32 %v2542_v53, %v612_v48 }
 0x1e8   : > { %v630_v51 = vmax.f32 %v613_v49, 0.0 }
 0x1ea   : > { %v638_v52 = vpack.c.bf16 %v630_v51, %v629_v50 }
 0x1ec   : > { %2249 = vmatmul.msk.bf16.gmra.mxu2 %vm664_vm0, %v638_v52 }
 0x1ff   : > { %v698_v54 = vpop.f32.mrf.mxu2 }
 0x200   : > { %v699_v48 = vadd.f32 %v2543_v4, %v698_v54  ;;  %v2448_v54 = vld [vmem:[#allocation7 + $0x30] sm:$0xff] }
 0x202   : > { %v738_v52 = vmax.f32 %v699_v48, 0.0 }
 0x207   : > { %v700_v55 = vpop.f32.mrf.mxu2 }
 0x208   : > { %v701_v45 = vadd.f32 %v2543_v4, %v700_v55  ;;  %v2449_v55 = vld [vmem:[#allocation7 + $0x38] sm:$0xff] }
 0x209   : > { %892 = vmatpush.bf16.msrb.mxu2 %v2449_v55 }
 0x20a   : > { %v739_v50 = vmax.f32 %v701_v45, 0.0 }
 0x20d   : > { %893 = vmatpush.bf16.msrb.mxu2 %v2448_v54 }
 0x20f   : > { %v703_v56 = vpop.f32.mrf.mxu2 }
 0x210   : > { %v704_v43 = vadd.f32 %v2543_v4, %v703_v56  ;;  %v2447_v56 = vld [vmem:[#allocation7 + $0x28] sm:$0xff] }
 0x211   : > { %894 = vmatpush.bf16.msrb.mxu2 %v2447_v56 }
 0x212   : > { %v740_v49 = vmax.f32 %v704_v43, 0.0 }
 0x217   : > { %v705_v57 = vpop.f32.mrf.mxu2 }
 0x218   : > { %v706_v40 = vadd.f32 %v2543_v4, %v705_v57  ;;  %v2446_v57 = vld [vmem:[#allocation7 + $0x20] sm:$0xff] }
 0x219   : > { %895 = vmatpush.bf16.msrb.mxu2 %v2446_v57 }
 0x21a   : > { %v741_v46 = vmax.f32 %v706_v40, 0.0 }
 0x21c   : > { %v755_v51 = vpack.c.bf16 %v741_v46, %v740_v49 }
 0x21f   : > { %v708_v58 = vpop.f32.mrf.mxu2 }
 0x220   : > { %v709_v38 = vadd.f32 %v2543_v4, %v708_v58 }
 0x222   : > { %v742_v44 = vmax.f32 %v709_v38, 0.0 }
 0x227   : > { %v710_v59 = vpop.f32.mrf.mxu2 }
 0x228   : > { %v711_v35 = vadd.f32 %v2543_v4, %v710_v59  ;;  %v754_v59 = vpack.c.bf16 %v739_v50, %v738_v52 }
 0x22a   : > { %v743_v41 = vmax.f32 %v711_v35, 0.0 }
 0x22c   : > { %v756_v47 = vpack.c.bf16 %v743_v41, %v742_v44 }
 0x22f   : > { %v713_v60 = vpop.f32.mrf.mxu2 }
 0x230   : > { %v714_v33 = vadd.f32 %v2543_v4, %v713_v60 }
 0x232   : > { %v744_v39 = vmax.f32 %v714_v33, 0.0 }
 0x237   : > { %v715_v61 = vpop.f32.mrf.mxu2 }
 0x238   : > { %v716_v30 = vadd.f32 %v2543_v4, %v715_v61 }
 0x23a   : > { %v745_v36 = vmax.f32 %v716_v30, 0.0 }
 0x23c   : > { %v757_v42 = vpack.c.bf16 %v745_v36, %v744_v39 }
 0x23f   : > { %v718_v62 = vpop.f32.mrf.mxu2 }
 0x240   : > { %v719_v28 = vadd.f32 %v2543_v4, %v718_v62 }
 0x242   : > { %v746_v34 = vmax.f32 %v719_v28, 0.0  ;;  %v2450_v28 = vld [vmem:[#allocation7 + $0x40] sm:$0xff] }
 0x247   : > { %v720_v63 = vpop.f32.mrf.mxu2 }
 0x248   : > { %v721_v25 = vadd.f32 %v2543_v4, %v720_v63 }
 0x24a   : > { %v747_v31 = vmax.f32 %v721_v25, 0.0  ;;  %v2452_v25 = vld [vmem:[#allocation7 + $0x50] sm:$0xff] }
 0x24c   : > { %v758_v37 = vpack.c.bf16 %v747_v31, %v746_v34  ;;  %v2544_v31 = vld [vmem:[%s3190_s4 + $0x2] ss:$0 sm:$0xff] }
 0x24f   : > { %v723_v0 = vpop.f32.mrf.mxu2 }
 0x250   : > { %v724_v22 = vadd.f32 %v2543_v4, %v723_v0 }
 0x252   : > { %v748_v29 = vmax.f32 %v724_v22, 0.0 }
 0x257   : > { %v725_v1 = vpop.f32.mrf.mxu2 }
 0x258   : > { %v726_v18 = vadd.f32 %v2543_v4, %v725_v1 }
 0x25a   : > { %v749_v26 = vmax.f32 %v726_v18, 0.0  ;;  %v2453_v18 = vld [vmem:[#allocation7 + $0x58] sm:$0xff] }
 0x25b   : > { %1014 = vmatpush.bf16.msrb.mxu0 %v2453_v18 }
 0x25c   : > { %v759_v32 = vpack.c.bf16 %v749_v26, %v748_v29  ;;  %v2451_v26 = vld [vmem:[#allocation7 + $0x48] sm:$0xff] }
 0x25f   : > { %v728_v2 = vpop.f32.mrf.mxu2  ;;  %1015 = vmatpush.bf16.msrb.mxu0 %v2452_v25 }
 0x260   : > { %v729_v14 = vadd.f32 %v2543_v4, %v728_v2 }
 0x262   : > { %v750_v24 = vmax.f32 %v729_v14, 0.0 }
 0x263   : > { %1016 = vmatpush.bf16.msrb.mxu0 %v2451_v26 }
 0x267   : > { %v730_v3 = vpop.f32.mrf.mxu2  ;;  %1017 = vmatpush.bf16.msrb.mxu0 %v2450_v28 }
 0x268   : > { %v731_v7 = vadd.f32 %v2543_v4, %v730_v3 }
 0x26a   : > { %v751_v19 = vmax.f32 %v731_v7, 0.0 }
 0x26c   : > { %v760_v27 = vpack.c.bf16 %v751_v19, %v750_v24 }
 0x26f   : > { %v733_v53 = vpop.f32.mrf.mxu2 }
 0x270   : > { %v734_v5 = vadd.f32 %v2543_v4, %v733_v53 }
 0x272   : > { %v752_v16 = vmax.f32 %v734_v5, 0.0 }
 0x277   : > { %v735_v6 = vpop.f32.mrf.mxu2 }
 0x278   : > { %v736_v13 = vadd.f32 %v2543_v4, %v735_v6 }
 0x27a   : > { %v753_v17 = vmax.f32 %v736_v13, 0.0 }
 0x27c   : > { %v761_v21 = vpack.c.bf16 %v753_v17, %v752_v16 }
 0x27e   : > { %762 = vmatpush.bf16.msra.mxu3 %v761_v21 }
 0x282   : > { %763 = vmatpush.bf16.msra.mxu3 %v760_v27 }
 0x286   : > { %764 = vmatpush.bf16.msra.mxu3 %v759_v32 }
 0x28a   : > { %765 = vmatpush.bf16.msra.mxu3 %v758_v37 }
 0x28e   : > { %766 = vmatpush.bf16.msra.mxu3 %v757_v42 }
 0x292   : > { %767 = vmatpush.bf16.msra.mxu3 %v756_v47 }
 0x296   : > { %768 = vmatpush.bf16.msra.mxu3 %v755_v51 }
 0x29a   : > { %769 = vmatpush.bf16.msra.mxu3 %v754_v59 }
 0x29d   : > { %770 = vmatmul.bf16.vlgmr.msra.gmra.mxu3 %v2904_v8 }
 0x2ad   : > { %775 = vmatmul.bf16.gmra.mxu3 %v2908_v9 }
 0x2bd   : > { %780 = vmatmul.bf16.gmra.mxu3 %v2912_v10 }
 0x2cd   : > { %785 = vmatmul.bf16.gmra.mxu3 %v2916_v11 }
 0x2dd   : > { %790 = vmatmul.bf16.gmra.mxu3 %v2920_v12 }
 0x2ed   : > { %795 = vmatmul.bf16.gmra.mxu3 %v2930_v15 }
 0x2fd   : > { %800 = vmatmul.bf16.gmra.mxu3 %v2946_v20 }
 0x30d   : > { %805 = vmatmul.bf16.gmra.mxu3 %v2956_v23 }
 0x320   : > { %v771_v58 = vpop.f32.mrf.mxu3 }
 0x328   : > { %v773_v60 = vpop.f32.mrf.mxu3 }
 0x329   : > { %v831_v61 = vpack.c.bf16 %v773_v60, %v771_v58 }
 0x32b   : > { %2266 = vmatmul.msk.bf16.vlgmr.msrb.gmra.mxu2 %vm664_vm0, %v831_v61 }
 0x330   : > { %v776_v62 = vpop.f32.mrf.mxu3 }
 0x338   : > { %v778_v63 = vpop.f32.mrf.mxu3 }
 0x339   : > { %v832_v0 = vpack.c.bf16 %v778_v63, %v776_v62 }
 0x33b   : > { %2267 = vmatmul.msk.bf16.gmra.mxu2 %vm664_vm0, %v832_v0 }
 0x340   : > { %v781_v1 = vpop.f32.mrf.mxu3 }
 0x348   : > { %v783_v2 = vpop.f32.mrf.mxu3 }
 0x349   : > { %v833_v3 = vpack.c.bf16 %v783_v2, %v781_v1 }
 0x34b   : > { %2268 = vmatmul.msk.bf16.gmra.mxu2 %vm664_vm0, %v833_v3 }
 0x350   : > { %v786_v53 = vpop.f32.mrf.mxu3 }
 0x358   : > { %v788_v4 = vpop.f32.mrf.mxu3 }
 0x359   : > { %v834_v5 = vpack.c.bf16 %v788_v4, %v786_v53 }
 0x35b   : > { %2269 = vmatmul.msk.bf16.gmra.mxu2 %vm664_vm0, %v834_v5 }
 0x360   : > { %v791_v6 = vpop.f32.mrf.mxu3 }
 0x368   : > { %v793_v7 = vpop.f32.mrf.mxu3 }
 0x369   : > { %v835_v13 = vpack.c.bf16 %v793_v7, %v791_v6 }
 0x36b   : > { %2270 = vmatmul.msk.bf16.gmra.mxu2 %vm664_vm0, %v835_v13 }
 0x370   : > { %v796_v14 = vpop.f32.mrf.mxu3 }
 0x378   : > { %v798_v16 = vpop.f32.mrf.mxu3 }
 0x379   : > { %v836_v17 = vpack.c.bf16 %v798_v16, %v796_v14 }
 0x37b   : > { %2271 = vmatmul.msk.bf16.gmra.mxu2 %vm664_vm0, %v836_v17 }
 0x380   : > { %v801_v19 = vpop.f32.mrf.mxu3 }
 0x388   : > { %v803_v21 = vpop.f32.mrf.mxu3 }
 0x389   : > { %v837_v22 = vpack.c.bf16 %v803_v21, %v801_v19 }
 0x38b   : > { %2272 = vmatmul.msk.bf16.gmra.mxu2 %vm664_vm0, %v837_v22 }
 0x390   : > { %v806_v24 = vpop.f32.mrf.mxu3 }
 0x398   : > { %v808_v27 = vpop.f32.mrf.mxu3 }
 0x399   : > { %v838_v29 = vpack.c.bf16 %v808_v27, %v806_v24 }
 0x39b   : > { %2273 = vmatmul.msk.bf16.gmra.mxu2 %vm664_vm0, %v838_v29 }
 0x3ae   : > { %v897_v30 = vpop.f32.mrf.mxu2 }
 0x3af   : > { %v898_v32 = vadd.f32 %v2544_v31, %v897_v30 }
 0x3b1   : > { %v937_v35 = vmax.f32 %v898_v32, 0.0 }
 0x3b6   : > { %v899_v33 = vpop.f32.mrf.mxu2 }
 0x3b7   : > { %v900_v34 = vadd.f32 %v2544_v31, %v899_v33 }
 0x3b9   : > { %v938_v36 = vmax.f32 %v900_v34, 0.0 }
 0x3bb   : > { %v953_v37 = vpack.c.bf16 %v938_v36, %v937_v35 }
 0x3bd   : > { %2290 = vmatmul.msk.bf16.vlgmr.msrb.gmra.mxu0 %vm664_vm0, %v953_v37 }
 0x3be   : > { %v902_v38 = vpop.f32.mrf.mxu2 }
 0x3bf   : > { %v903_v39 = vadd.f32 %v2544_v31, %v902_v38 }
 0x3c1   : > { %v939_v42 = vmax.f32 %v903_v39, 0.0 }
 0x3c6   : > { %v904_v40 = vpop.f32.mrf.mxu2 }
 0x3c7   : > { %v905_v41 = vadd.f32 %v2544_v31, %v904_v40 }
 0x3c9   : > { %v940_v43 = vmax.f32 %v905_v41, 0.0 }
 0x3cb   : > { %v954_v44 = vpack.c.bf16 %v940_v43, %v939_v42 }
 0x3cd   : > { %2291 = vmatmul.msk.bf16.gmra.mxu0 %vm664_vm0, %v954_v44 }
 0x3ce   : > { %v907_v45 = vpop.f32.mrf.mxu2 }
 0x3cf   : > { %v908_v46 = vadd.f32 %v2544_v31, %v907_v45 }
 0x3d1   : > { %v941_v49 = vmax.f32 %v908_v46, 0.0  ;;  %v2545_v46 = vld [vmem:[%s3190_s4 + $0x3] ss:$0 sm:$0xff] }
 0x3d6   : > { %v909_v47 = vpop.f32.mrf.mxu2 }
 0x3d7   : > { %v910_v48 = vadd.f32 %v2544_v31, %v909_v47 }
 0x3d9   : > { %v942_v50 = vmax.f32 %v910_v48, 0.0 }
 0x3db   : > { %v955_v51 = vpack.c.bf16 %v942_v50, %v941_v49 }
 0x3dd   : > { %2292 = vmatmul.msk.bf16.gmra.mxu0 %vm664_vm0, %v955_v51 }
 0x3de   : > { %v912_v52 = vpop.f32.mrf.mxu2 }
 0x3df   : > { %v913_v59 = vadd.f32 %v2544_v31, %v912_v52 }
 0x3e1   : > { %v943_v56 = vmax.f32 %v913_v59, 0.0 }
 0x3e6   : > { %v914_v55 = vpop.f32.mrf.mxu2 }
 0x3e7   : > { %v915_v54 = vadd.f32 %v2544_v31, %v914_v55 }
 0x3e9   : > { %v944_v57 = vmax.f32 %v915_v54, 0.0 }
 0x3eb   : > { %v956_v58 = vpack.c.bf16 %v944_v57, %v943_v56 }
 0x3ed   : > { %2293 = vmatmul.msk.bf16.gmra.mxu0 %vm664_vm0, %v956_v58 }
 0x3ee   : > { %v917_v60 = vpop.f32.mrf.mxu2 }
 0x3ef   : > { %v918_v61 = vadd.f32 %v2544_v31, %v917_v60 }
 0x3f1   : > { %v945_v0 = vmax.f32 %v918_v61, 0.0 }
 0x3f6   : > { %v919_v62 = vpop.f32.mrf.mxu2 }
 0x3f7   : > { %v920_v63 = vadd.f32 %v2544_v31, %v919_v62 }
 0x3f9   : > { %v946_v1 = vmax.f32 %v920_v63, 0.0 }
 0x3fb   : > { %v957_v2 = vpack.c.bf16 %v946_v1, %v945_v0 }
 0x3fd   : > { %2294 = vmatmul.msk.bf16.gmra.mxu0 %vm664_vm0, %v957_v2 }
 0x3fe   : > { %v922_v3 = vpop.f32.mrf.mxu2 }
 0x3ff   : > { %v923_v53 = vadd.f32 %v2544_v31, %v922_v3 }
 0x401   : > { %v947_v6 = vmax.f32 %v923_v53, 0.0 }
 0x406   : > { %v924_v4 = vpop.f32.mrf.mxu2 }
 0x407   : > { %v925_v5 = vadd.f32 %v2544_v31, %v924_v4 }
 0x409   : > { %v948_v7 = vmax.f32 %v925_v5, 0.0 }
 0x40b   : > { %v958_v13 = vpack.c.bf16 %v948_v7, %v947_v6 }
 0x40d   : > { %2295 = vmatmul.msk.bf16.gmra.mxu0 %vm664_vm0, %v958_v13 }
 0x40e   : > { %v927_v14 = vpop.f32.mrf.mxu2 }
 0x40f   : > { %v928_v16 = vadd.f32 %v2544_v31, %v927_v14 }
 0x411   : > { %v949_v19 = vmax.f32 %v928_v16, 0.0 }
 0x416   : > { %v929_v17 = vpop.f32.mrf.mxu2 }
 0x417   : > { %v930_v18 = vadd.f32 %v2544_v31, %v929_v17 }
 0x419   : > { %v950_v21 = vmax.f32 %v930_v18, 0.0 }
 0x41b   : > { %v959_v22 = vpack.c.bf16 %v950_v21, %v949_v19 }
 0x41d   : > { %2296 = vmatmul.msk.bf16.gmra.mxu0 %vm664_vm0, %v959_v22 }
 0x41e   : > { %v932_v24 = vpop.f32.mrf.mxu2 }
 0x41f   : > { %v933_v25 = vadd.f32 %v2544_v31, %v932_v24 }
 0x421   : > { %v951_v28 = vmax.f32 %v933_v25, 0.0 }
 0x426   : > { %v934_v26 = vpop.f32.mrf.mxu2 }
 0x427   : > { %v935_v27 = vadd.f32 %v2544_v31, %v934_v26 }
 0x429   : > { %v952_v29 = vmax.f32 %v935_v27, 0.0 }
 0x42b   : > { %v960_v30 = vpack.c.bf16 %v952_v29, %v951_v28 }
 0x42d   : > { %2297 = vmatmul.msk.bf16.gmra.mxu0 %vm664_vm0, %v960_v30 }
 0x43a   : > { %v1019_v32 = vpop.f32.mrf.mxu0 }
 0x43b   : > { %v1020_v26 = vadd.f32 %v2545_v46, %v1019_v32  ;;  %v2456_v32 = vld [vmem:[#allocation7 + $0x70] sm:$0xff] }
 0x43d   : > { %v1059_v30 = vmax.f32 %v1020_v26, 0.0 }
 0x442   : > { %v1021_v33 = vpop.f32.mrf.mxu0 }
 0x443   : > { %v1022_v22 = vadd.f32 %v2545_v46, %v1021_v33  ;;  %v2457_v33 = vld [vmem:[#allocation7 + $0x78] sm:$0xff] }
 0x444   : > { %1213 = vmatpush.bf16.msrb.mxu3 %v2457_v33 }
 0x445   : > { %v1060_v28 = vmax.f32 %v1022_v22, 0.0 }
 0x448   : > { %1214 = vmatpush.bf16.msrb.mxu3 %v2456_v32 }
 0x44a   : > { %v1024_v34 = vpop.f32.mrf.mxu0 }
 0x44b   : > { %v1025_v19 = vadd.f32 %v2545_v46, %v1024_v34  ;;  %v2455_v34 = vld [vmem:[#allocation7 + $0x68] sm:$0xff] }
 0x44c   : > { %1215 = vmatpush.bf16.msrb.mxu3 %v2455_v34 }
 0x44d   : > { %v1061_v27 = vmax.f32 %v1025_v19, 0.0 }
 0x452   : > { %v1026_v35 = vpop.f32.mrf.mxu0 }
 0x453   : > { %v1027_v16 = vadd.f32 %v2545_v46, %v1026_v35  ;;  %v2454_v35 = vld [vmem:[#allocation7 + $0x60] sm:$0xff] }
 0x454   : > { %1216 = vmatpush.bf16.msrb.mxu3 %v2454_v35 }
 0x455   : > { %v1062_v24 = vmax.f32 %v1027_v16, 0.0 }
 0x457   : > { %v1076_v29 = vpack.c.bf16 %v1062_v24, %v1061_v27 }
 0x45a   : > { %v1029_v36 = vpop.f32.mrf.mxu0 }
 0x45b   : > { %v1030_v13 = vadd.f32 %v2545_v46, %v1029_v36 }
 0x45d   : > { %v1063_v21 = vmax.f32 %v1030_v13, 0.0 }
 0x462   : > { %v1031_v37 = vpop.f32.mrf.mxu0 }
 0x463   : > { %v1032_v5 = vadd.f32 %v2545_v46, %v1031_v37  ;;  %v1075_v37 = vpack.c.bf16 %v1060_v28, %v1059_v30 }
 0x465   : > { %v1064_v17 = vmax.f32 %v1032_v5, 0.0 }
 0x467   : > { %v1077_v25 = vpack.c.bf16 %v1064_v17, %v1063_v21 }
 0x46a   : > { %v1034_v38 = vpop.f32.mrf.mxu0 }
 0x46b   : > { %v1035_v53 = vadd.f32 %v2545_v46, %v1034_v38 }
 0x46d   : > { %v1065_v14 = vmax.f32 %v1035_v53, 0.0 }
 0x472   : > { %v1036_v39 = vpop.f32.mrf.mxu0 }
 0x473   : > { %v1037_v1 = vadd.f32 %v2545_v46, %v1036_v39 }
 0x475   : > { %v1066_v6 = vmax.f32 %v1037_v1, 0.0 }
 0x477   : > { %v1078_v18 = vpack.c.bf16 %v1066_v6, %v1065_v14 }
 0x47a   : > { %v1039_v40 = vpop.f32.mrf.mxu0 }
 0x47b   : > { %v1040_v63 = vadd.f32 %v2545_v46, %v1039_v40 }
 0x47d   : > { %v1067_v4 = vmax.f32 %v1040_v63, 0.0 }
 0x482   : > { %v1041_v41 = vpop.f32.mrf.mxu0 }
 0x483   : > { %v1042_v60 = vadd.f32 %v2545_v46, %v1041_v41 }
 0x485   : > { %v1068_v2 = vmax.f32 %v1042_v60, 0.0 }
 0x487   : > { %v1079_v7 = vpack.c.bf16 %v1068_v2, %v1067_v4 }
 0x48a   : > { %v1044_v42 = vpop.f32.mrf.mxu0 }
 0x48b   : > { %v1045_v57 = vadd.f32 %v2545_v46, %v1044_v42 }
 0x48d   : > { %v1069_v0 = vmax.f32 %v1045_v57, 0.0  ;;  %v2546_v57 = vld [vmem:[%s3190_s4 + $0x4] ss:$0 sm:$0xff] }
 0x492   : > { %v1046_v43 = vpop.f32.mrf.mxu0 }
 0x493   : > { %v1047_v55 = vadd.f32 %v2545_v46, %v1046_v43 }
 0x495   : > { %v1070_v61 = vmax.f32 %v1047_v55, 0.0  ;;  %v2458_v55 = vld [vmem:[#allocation7 + $0x80] sm:$0xff] }
 0x497   : > { %v1080_v3 = vpack.c.bf16 %v1070_v61, %v1069_v0 }
 0x49a   : > { %v1049_v44 = vpop.f32.mrf.mxu0 }
 0x49b   : > { %v1050_v51 = vadd.f32 %v2545_v46, %v1049_v44 }
 0x49d   : > { %v1071_v58 = vmax.f32 %v1050_v51, 0.0  ;;  %v2460_v51 = vld [vmem:[#allocation7 + $0x90] sm:$0xff] }
 0x4a2   : > { %v1051_v45 = vpop.f32.mrf.mxu0 }
 0x4a3   : > { %v1052_v49 = vadd.f32 %v2545_v46, %v1051_v45 }
 0x4a5   : > { %v1072_v54 = vmax.f32 %v1052_v49, 0.0 }
 0x4a7   : > { %v1081_v62 = vpack.c.bf16 %v1072_v54, %v1071_v58 }
 0x4aa   : > { %v1054_v31 = vpop.f32.mrf.mxu0 }
 0x4ab   : > { %v1055_v47 = vadd.f32 %v2545_v46, %v1054_v31 }
 0x4ad   : > { %v1073_v52 = vmax.f32 %v1055_v47, 0.0 }
 0x4b2   : > { %v1056_v48 = vpop.f32.mrf.mxu0 }
 0x4b3   : > { %v1057_v50 = vadd.f32 %v2545_v46, %v1056_v48  ;;  %v2461_v46 = vld [vmem:[#allocation7 + $0x98] sm:$0xff] }
 0x4b4   : > { %1335 = vmatpush.bf16.msra.mxu2 %v2461_v46 }
 0x4b5   : > { %v1074_v59 = vmax.f32 %v1057_v50, 0.0 }
 0x4b7   : > { %v1082_v56 = vpack.c.bf16 %v1074_v59, %v1073_v52  ;;  %v2459_v52 = vld [vmem:[#allocation7 + $0x88] sm:$0xff] }
 0x4b8   : > { %1336 = vmatpush.bf16.msra.mxu2 %v2460_v51 }
 0x4b9   : > { %1083 = vmatpush.bf16.msrb.mxu1 %v1082_v56 }
 0x4bc   : > { %1337 = vmatpush.bf16.msra.mxu2 %v2459_v52 }
 0x4bd   : > { %1084 = vmatpush.bf16.msrb.mxu1 %v1081_v62 }
 0x4c0   : > { %1338 = vmatpush.bf16.msra.mxu2 %v2458_v55 }
 0x4c1   : > { %1085 = vmatpush.bf16.msrb.mxu1 %v1080_v3 }
 0x4c5   : > { %1086 = vmatpush.bf16.msrb.mxu1 %v1079_v7 }
 0x4c9   : > { %1087 = vmatpush.bf16.msrb.mxu1 %v1078_v18 }
 0x4cd   : > { %1088 = vmatpush.bf16.msrb.mxu1 %v1077_v25 }
 0x4d1   : > { %1089 = vmatpush.bf16.msrb.mxu1 %v1076_v29 }
 0x4d5   : > { %1090 = vmatpush.bf16.msrb.mxu1 %v1075_v37 }
 0x4d8   : > { %1091 = vmatmul.bf16.vlgmr.msrb.gmra.mxu1 %v2904_v8 }
 0x4e8   : > { %1096 = vmatmul.bf16.gmra.mxu1 %v2908_v9 }
 0x4f8   : > { %1101 = vmatmul.bf16.gmra.mxu1 %v2912_v10 }
 0x508   : > { %1106 = vmatmul.bf16.gmra.mxu1 %v2916_v11 }
 0x518   : > { %1111 = vmatmul.bf16.gmra.mxu1 %v2920_v12 }
 0x528   : > { %1116 = vmatmul.bf16.gmra.mxu1 %v2930_v15 }
 0x538   : > { %1121 = vmatmul.bf16.gmra.mxu1 %v2946_v20 }
 0x548   : > { %1126 = vmatmul.bf16.gmra.mxu1 %v2956_v23 }
 0x555   : > { %v1092_v8 = vpop.f32.mrf.mxu1 }
 0x55d   : > { %v1094_v9 = vpop.f32.mrf.mxu1 }
 0x55e   : > { %v1152_v10 = vpack.c.bf16 %v1094_v9, %v1092_v8 }
 0x560   : > { %2314 = vmatmul.msk.bf16.vlgmr.msrb.gmra.mxu3 %vm664_vm0, %v1152_v10 }
 0x565   : > { %v1097_v11 = vpop.f32.mrf.mxu1 }
 0x56d   : > { %v1099_v12 = vpop.f32.mrf.mxu1 }
 0x56e   : > { %v1153_v36 = vpack.c.bf16 %v1099_v12, %v1097_v11 }
 0x570   : > { %2315 = vmatmul.msk.bf16.gmra.mxu3 %vm664_vm0, %v1153_v36 }
 0x575   : > { %v1102_v15 = vpop.f32.mrf.mxu1 }
 0x57d   : > { %v1104_v38 = vpop.f32.mrf.mxu1 }
 0x57e   : > { %v1154_v39 = vpack.c.bf16 %v1104_v38, %v1102_v15 }
 0x580   : > { %2316 = vmatmul.msk.bf16.gmra.mxu3 %vm664_vm0, %v1154_v39 }
 0x585   : > { %v1107_v20 = vpop.f32.mrf.mxu1 }
 0x58d   : > { %v1109_v40 = vpop.f32.mrf.mxu1 }
 0x58e   : > { %v1155_v41 = vpack.c.bf16 %v1109_v40, %v1107_v20 }
 0x590   : > { %2317 = vmatmul.msk.bf16.gmra.mxu3 %vm664_vm0, %v1155_v41 }
 0x595   : > { %v1112_v23 = vpop.f32.mrf.mxu1 }
 0x59d   : > { %v1114_v42 = vpop.f32.mrf.mxu1 }
 0x59e   : > { %v1156_v43 = vpack.c.bf16 %v1114_v42, %v1112_v23 }
 0x5a0   : > { %2318 = vmatmul.msk.bf16.gmra.mxu3 %vm664_vm0, %v1156_v43 }
 0x5a5   : > { %v1117_v44 = vpop.f32.mrf.mxu1 }
 0x5ad   : > { %v1119_v45 = vpop.f32.mrf.mxu1 }
 0x5ae   : > { %v1157_v31 = vpack.c.bf16 %v1119_v45, %v1117_v44 }
 0x5b0   : > { %2319 = vmatmul.msk.bf16.gmra.mxu3 %vm664_vm0, %v1157_v31 }
 0x5b5   : > { %v1122_v47 = vpop.f32.mrf.mxu1 }
 0x5bd   : > { %v1124_v48 = vpop.f32.mrf.mxu1 }
 0x5be   : > { %v1158_v49 = vpack.c.bf16 %v1124_v48, %v1122_v47 }
 0x5c0   : > { %2320 = vmatmul.msk.bf16.gmra.mxu3 %vm664_vm0, %v1158_v49 }
 0x5c5   : > { %v1127_v50 = vpop.f32.mrf.mxu1 }
 0x5cd   : > { %v1129_v59 = vpop.f32.mrf.mxu1 }
 0x5ce   : > { %v1159_v54 = vpack.c.bf16 %v1129_v59, %v1127_v50  ;;  %v2547_v50 = vld [vmem:[%s3190_s4 + $0x5] ss:$0 sm:$0xff] }
 0x5d0   : > { %2321 = vmatmul.msk.bf16.gmra.mxu3 %vm664_vm0, %v1159_v54 }
 0x5e3   : > { %v1218_v56 = vpop.f32.mrf.mxu3 }
 0x5e4   : > { %v1219_v58 = vadd.f32 %v2546_v57, %v1218_v56 }
 0x5e6   : > { %v1258_v62 = vmax.f32 %v1219_v58, 0.0 }
 0x5eb   : > { %v1220_v60 = vpop.f32.mrf.mxu3 }
 0x5ec   : > { %v1221_v61 = vadd.f32 %v2546_v57, %v1220_v60 }
 0x5ee   : > { %v1259_v63 = vmax.f32 %v1221_v61, 0.0 }
 0x5f0   : > { %v1274_v0 = vpack.c.bf16 %v1259_v63, %v1258_v62 }
 0x5f2   : > { %2338 = vmatmul.msk.bf16.vlgmr.msra.gmra.mxu2 %vm664_vm0, %v1274_v0 }
 0x5f3   : > { %v1223_v1 = vpop.f32.mrf.mxu3 }
 0x5f4   : > { %v1224_v2 = vadd.f32 %v2546_v57, %v1223_v1 }
 0x5f6   : > { %v1260_v4 = vmax.f32 %v1224_v2, 0.0 }
 0x5fb   : > { %v1225_v3 = vpop.f32.mrf.mxu3 }
 0x5fc   : > { %v1226_v53 = vadd.f32 %v2546_v57, %v1225_v3 }
 0x5fe   : > { %v1261_v5 = vmax.f32 %v1226_v53, 0.0 }
 0x600   : > { %v1275_v6 = vpack.c.bf16 %v1261_v5, %v1260_v4 }
 0x602   : > { %2339 = vmatmul.msk.bf16.gmra.mxu2 %vm664_vm0, %v1275_v6 }
 0x603   : > { %v1228_v7 = vpop.f32.mrf.mxu3 }
 0x604   : > { %v1229_v13 = vadd.f32 %v2546_v57, %v1228_v7 }
 0x606   : > { %v1262_v17 = vmax.f32 %v1229_v13, 0.0 }
 0x60b   : > { %v1230_v14 = vpop.f32.mrf.mxu3 }
 0x60c   : > { %v1231_v16 = vadd.f32 %v2546_v57, %v1230_v14 }
 0x60e   : > { %v1263_v18 = vmax.f32 %v1231_v16, 0.0 }
 0x610   : > { %v1276_v19 = vpack.c.bf16 %v1263_v18, %v1262_v17 }
 0x612   : > { %2340 = vmatmul.msk.bf16.gmra.mxu2 %vm664_vm0, %v1276_v19 }
 0x613   : > { %v1233_v21 = vpop.f32.mrf.mxu3 }
 0x614   : > { %v1234_v22 = vadd.f32 %v2546_v57, %v1233_v21 }
 0x616   : > { %v1264_v26 = vmax.f32 %v1234_v22, 0.0 }
 0x61b   : > { %v1235_v24 = vpop.f32.mrf.mxu3 }
 0x61c   : > { %v1236_v25 = vadd.f32 %v2546_v57, %v1235_v24 }
 0x61e   : > { %v1265_v27 = vmax.f32 %v1236_v25, 0.0 }
 0x620   : > { %v1277_v28 = vpack.c.bf16 %v1265_v27, %v1264_v26 }
 0x622   : > { %2341 = vmatmul.msk.bf16.gmra.mxu2 %vm664_vm0, %v1277_v28 }
 0x623   : > { %v1238_v29 = vpop.f32.mrf.mxu3 }
 0x624   : > { %v1239_v30 = vadd.f32 %v2546_v57, %v1238_v29 }
 0x626   : > { %v1266_v32 = vmax.f32 %v1239_v30, 0.0 }
 0x62b   : > { %v1240_v37 = vpop.f32.mrf.mxu3 }
 0x62c   : > { %v1241_v33 = vadd.f32 %v2546_v57, %v1240_v37 }
 0x62e   : > { %v1267_v34 = vmax.f32 %v1241_v33, 0.0 }
 0x630   : > { %v1278_v35 = vpack.c.bf16 %v1267_v34, %v1266_v32 }
 0x632   : > { %2342 = vmatmul.msk.bf16.gmra.mxu2 %vm664_vm0, %v1278_v35 }
 0x633   : > { %v1243_v8 = vpop.f32.mrf.mxu3 }
 0x634   : > { %v1244_v9 = vadd.f32 %v2546_v57, %v1243_v8 }
 0x636   : > { %v1268_v12 = vmax.f32 %v1244_v9, 0.0 }
 0x63b   : > { %v1245_v10 = vpop.f32.mrf.mxu3 }
 0x63c   : > { %v1246_v11 = vadd.f32 %v2546_v57, %v1245_v10 }
 0x63e   : > { %v1269_v36 = vmax.f32 %v1246_v11, 0.0 }
 0x640   : > { %v1279_v15 = vpack.c.bf16 %v1269_v36, %v1268_v12 }
 0x642   : > { %2343 = vmatmul.msk.bf16.gmra.mxu2 %vm664_vm0, %v1279_v15 }
 0x643   : > { %v1248_v38 = vpop.f32.mrf.mxu3 }
 0x644   : > { %v1249_v39 = vadd.f32 %v2546_v57, %v1248_v38 }
 0x646   : > { %v1270_v41 = vmax.f32 %v1249_v39, 0.0 }
 0x64b   : > { %v1250_v20 = vpop.f32.mrf.mxu3 }
 0x64c   : > { %v1251_v40 = vadd.f32 %v2546_v57, %v1250_v20 }
 0x64e   : > { %v1271_v23 = vmax.f32 %v1251_v40, 0.0 }
 0x650   : > { %v1280_v42 = vpack.c.bf16 %v1271_v23, %v1270_v41 }
 0x652   : > { %2344 = vmatmul.msk.bf16.gmra.mxu2 %vm664_vm0, %v1280_v42 }
 0x653   : > { %v1253_v43 = vpop.f32.mrf.mxu3 }
 0x654   : > { %v1254_v44 = vadd.f32 %v2546_v57, %v1253_v43  ;;  %v2550_v43 = vld [vmem:[%s2888_s23] sm:$0xff] }
 0x656   : > { %v1272_v46 = vmax.f32 %v1254_v44, 0.0  ;;  %v2551_v44 = vld [vmem:[%s2888_s23 + $0x8] sm:$0xff] }
 0x65b   : > { %v1255_v45 = vpop.f32.mrf.mxu3 }
 0x65c   : > { %v1256_v31 = vadd.f32 %v2546_v57, %v1255_v45  ;;  %v2552_v45 = vld [vmem:[%s2888_s23 + $0x10] sm:$0xff] }
 0x65e   : > { %v1273_v47 = vmax.f32 %v1256_v31, 0.0  ;;  %v2553_v31 = vld [vmem:[%s2888_s23 + $0x18] sm:$0xff] }
 0x660   : > { %v1281_v48 = vpack.c.bf16 %v1273_v47, %v1272_v46  ;;  %v2554_v46 = vld [vmem:[%s2888_s23 + $0x20] sm:$0xff]  ;;  %v2465_v47 = vld [vmem:[#allocation7 + $0xb8] sm:$0xff] }
 0x661   : > { %1534 = vmatpush.bf16.msra.mxu1 %v2465_v47 }
 0x662   : > { %2345 = vmatmul.msk.bf16.gmra.mxu2 %vm664_vm0, %v1281_v48  ;;  %v2555_v48 = vld [vmem:[%s2888_s23 + $0x28] sm:$0xff] }
 0x675   : > { %v1340_v49 = vpop.f32.mrf.mxu2 }
 0x676   : > { %v1341_v51 = vadd.f32 %v2547_v50, %v1340_v49  ;;  %v2464_v49 = vld [vmem:[#allocation7 + $0xb0] sm:$0xff] }
 0x677   : > { %1535 = vmatpush.bf16.msra.mxu1 %v2464_v49 }
 0x678   : > { %v1380_v55 = vmax.f32 %v1341_v51, 0.0  ;;  %v2556_v51 = vld [vmem:[%s2888_s23 + $0x30] sm:$0xff] }
 0x67d   : > { %v1342_v52 = vpop.f32.mrf.mxu2 }
 0x67e   : > { %v1343_v59 = vadd.f32 %v2547_v50, %v1342_v52  ;;  %v2462_v52 = vld [vmem:[#allocation7 + $0xa0] sm:$0xff] }
 0x680   : > { %v1381_v54 = vmax.f32 %v1343_v59, 0.0  ;;  %v2557_v59 = vld [vmem:[%s2888_s23 + $0x38] sm:$0xff] }
 0x682   : > { %v1396_v56 = vpack.c.bf16 %v1381_v54, %v1380_v55 }
 0x685   : > { %v1345_v58 = vpop.f32.mrf.mxu2 }
 0x686   : > { %v1346_v60 = vadd.f32 %v2547_v50, %v1345_v58 }
 0x688   : > { %v1382_v62 = vmax.f32 %v1346_v60, 0.0 }
 0x68d   : > { %v1347_v61 = vpop.f32.mrf.mxu2 }
 0x68e   : > { %v1348_v57 = vadd.f32 %v2547_v50, %v1347_v61 }
 0x690   : > { %v1383_v63 = vmax.f32 %v1348_v57, 0.0 }
 0x692   : > { %v1397_v0 = vpack.c.bf16 %v1383_v63, %v1382_v62 }
 0x695   : > { %v1350_v1 = vpop.f32.mrf.mxu2 }
 0x696   : > { %v1351_v2 = vadd.f32 %v2547_v50, %v1350_v1 }
 0x698   : > { %v1384_v4 = vmax.f32 %v1351_v2, 0.0 }
 0x69d   : > { %v1352_v3 = vpop.f32.mrf.mxu2 }
 0x69e   : > { %v1353_v53 = vadd.f32 %v2547_v50, %v1352_v3 }
 0x6a0   : > { %v1385_v5 = vmax.f32 %v1353_v53, 0.0 }
 0x6a2   : > { %v1398_v6 = vpack.c.bf16 %v1385_v5, %v1384_v4 }
 0x6a5   : > { %v1355_v7 = vpop.f32.mrf.mxu2 }
 0x6a6   : > { %v1356_v13 = vadd.f32 %v2547_v50, %v1355_v7 }
 0x6a8   : > { %v1386_v17 = vmax.f32 %v1356_v13, 0.0  ;;  %v2469_v13 = vld [vmem:[#allocation7 + $0xd8] sm:$0xff] }
 0x6a9   : > { %1656 = vmatpush.bf16.msra.mxu3 %v2469_v13 }
 0x6ad   : > { %v1357_v14 = vpop.f32.mrf.mxu2 }
 0x6ae   : > { %v1358_v16 = vadd.f32 %v2547_v50, %v1357_v14 }
 0x6b0   : > { %v1387_v18 = vmax.f32 %v1358_v16, 0.0 }
 0x6b2   : > { %v1399_v19 = vpack.c.bf16 %v1387_v18, %v1386_v17  ;;  %v2468_v18 = vld [vmem:[#allocation7 + $0xd0] sm:$0xff] }
 0x6b3   : > { %1657 = vmatpush.bf16.msra.mxu3 %v2468_v18 }
 0x6b5   : > { %v1360_v21 = vpop.f32.mrf.mxu2 }
 0x6b6   : > { %v1361_v39 = vadd.f32 %v2547_v50, %v1360_v21 }
 0x6b8   : > { %v1388_v23 = vmax.f32 %v1361_v39, 0.0 }
 0x6bd   : > { %v1362_v22 = vpop.f32.mrf.mxu2 }
 0x6be   : > { %v1363_v36 = vadd.f32 %v2547_v50, %v1362_v22  ;;  %v2466_v22 = vld [vmem:[#allocation7 + $0xc0] sm:$0xff] }
 0x6c0   : > { %v1389_v40 = vmax.f32 %v1363_v36, 0.0 }
 0x6c2   : > { %v1400_v42 = vpack.c.bf16 %v1389_v40, %v1388_v23 }
 0x6c5   : > { %v1365_v24 = vpop.f32.mrf.mxu2 }
 0x6c6   : > { %v1366_v11 = vadd.f32 %v2547_v50, %v1365_v24 }
 0x6c8   : > { %v1390_v20 = vmax.f32 %v1366_v11, 0.0 }
 0x6cd   : > { %v1367_v25 = vpop.f32.mrf.mxu2 }
 0x6ce   : > { %v1368_v8 = vadd.f32 %v2547_v50, %v1367_v25 }
 0x6d0   : > { %v1391_v15 = vmax.f32 %v1368_v8, 0.0 }
 0x6d2   : > { %v1401_v41 = vpack.c.bf16 %v1391_v15, %v1390_v20 }
 0x6d5   : > { %v1370_v26 = vpop.f32.mrf.mxu2 }
 0x6d6   : > { %v1371_v32 = vadd.f32 %v2547_v50, %v1370_v26 }
 0x6d8   : > { %v1392_v12 = vmax.f32 %v1371_v32, 0.0 }
 0x6dd   : > { %v1372_v27 = vpop.f32.mrf.mxu2 }
 0x6de   : > { %v1373_v37 = vadd.f32 %v2547_v50, %v1372_v27  ;;  %v2548_v27 = vld [vmem:[%s3190_s4 + $0x6] ss:$0 sm:$0xff] }
 0x6e0   : > { %v1393_v9 = vmax.f32 %v1373_v37, 0.0 }
 0x6e2   : > { %v1402_v38 = vpack.c.bf16 %v1393_v9, %v1392_v12 }
 0x6e5   : > { %v1375_v28 = vpop.f32.mrf.mxu2 }
 0x6e6   : > { %v1376_v29 = vadd.f32 %v2547_v50, %v1375_v28 }
 0x6e8   : > { %v1394_v34 = vmax.f32 %v1376_v29, 0.0 }
 0x6ed   : > { %v1377_v30 = vpop.f32.mrf.mxu2 }
 0x6ee   : > { %v1378_v33 = vadd.f32 %v2547_v50, %v1377_v30  ;;  %v2463_v50 = vld [vmem:[#allocation7 + $0xa8] sm:$0xff] }
 0x6ef   : > { %1536 = vmatpush.bf16.msra.mxu1 %v2463_v50 }
 0x6f0   : > { %v1395_v35 = vmax.f32 %v1378_v33, 0.0 }
 0x6f2   : > { %v1403_v10 = vpack.c.bf16 %v1395_v35, %v1394_v34 }
 0x6f3   : > { %1537 = vmatpush.bf16.msra.mxu1 %v2462_v52 }
 0x6f4   : > { %1404 = vmatpush.bf16.msra.mxu0 %v1403_v10 }
 0x6f8   : > { %1405 = vmatpush.bf16.msra.mxu0 %v1402_v38 }
 0x6fc   : > { %1406 = vmatpush.bf16.msra.mxu0 %v1401_v41 }
 0x700   : > { %1407 = vmatpush.bf16.msra.mxu0 %v1400_v42 }
 0x704   : > { %1408 = vmatpush.bf16.msra.mxu0 %v1399_v19  ;;  %v2467_v19 = vld [vmem:[#allocation7 + $0xc8] sm:$0xff] }
 0x705   : > { %1658 = vmatpush.bf16.msra.mxu3 %v2467_v19 }
 0x708   : > { %1409 = vmatpush.bf16.msra.mxu0 %v1398_v6 }
 0x709   : > { %1659 = vmatpush.bf16.msra.mxu3 %v2466_v22 }
 0x70c   : > { %1410 = vmatpush.bf16.msra.mxu0 %v1397_v0 }
 0x710   : > { %1411 = vmatpush.bf16.msra.mxu0 %v1396_v56 }
 0x713   : > { %1412 = vmatmul.bf16.vlgmr.msra.gmra.mxu0 %v2550_v43 }
 0x723   : > { %1417 = vmatmul.bf16.gmra.mxu0 %v2551_v44 }
 0x733   : > { %1422 = vmatmul.bf16.gmra.mxu0 %v2552_v45 }
 0x743   : > { %1427 = vmatmul.bf16.gmra.mxu0 %v2553_v31 }
 0x753   : > { %1432 = vmatmul.bf16.gmra.mxu0 %v2554_v46 }
 0x763   : > { %1437 = vmatmul.bf16.gmra.mxu0 %v2555_v48 }
 0x773   : > { %1442 = vmatmul.bf16.gmra.mxu0 %v2556_v51 }
 0x783   : > { %1447 = vmatmul.bf16.gmra.mxu0 %v2557_v59 }
 0x790   : > { %v1413_v55 = vpop.f32.mrf.mxu0 }
 0x798   : > { %v1415_v54 = vpop.f32.mrf.mxu0 }
 0x799   : > { %v1473_v56 = vpack.c.bf16 %v1415_v54, %v1413_v55 }
 0x79b   : > { %2362 = vmatmul.msk.bf16.vlgmr.msra.gmra.mxu1 %vm664_vm0, %v1473_v56 }
 0x7a0   : > { %v1418_v58 = vpop.f32.mrf.mxu0 }
 0x7a8   : > { %v1420_v60 = vpop.f32.mrf.mxu0 }
 0x7a9   : > { %v1474_v61 = vpack.c.bf16 %v1420_v60, %v1418_v58 }
 0x7ab   : > { %2363 = vmatmul.msk.bf16.gmra.mxu1 %vm664_vm0, %v1474_v61 }
 0x7b0   : > { %v1423_v57 = vpop.f32.mrf.mxu0 }
 0x7b8   : > { %v1425_v62 = vpop.f32.mrf.mxu0 }
 0x7b9   : > { %v1475_v63 = vpack.c.bf16 %v1425_v62, %v1423_v57 }
 0x7bb   : > { %2364 = vmatmul.msk.bf16.gmra.mxu1 %vm664_vm0, %v1475_v63 }
 0x7c0   : > { %v1428_v0 = vpop.f32.mrf.mxu0 }
 0x7c8   : > { %v1430_v1 = vpop.f32.mrf.mxu0 }
 0x7c9   : > { %v1476_v2 = vpack.c.bf16 %v1430_v1, %v1428_v0 }
 0x7cb   : > { %2365 = vmatmul.msk.bf16.gmra.mxu1 %vm664_vm0, %v1476_v2 }
 0x7d0   : > { %v1433_v3 = vpop.f32.mrf.mxu0 }
 0x7d8   : > { %v1435_v53 = vpop.f32.mrf.mxu0 }
 0x7d9   : > { %v1477_v4 = vpack.c.bf16 %v1435_v53, %v1433_v3 }
 0x7db   : > { %2366 = vmatmul.msk.bf16.gmra.mxu1 %vm664_vm0, %v1477_v4 }
 0x7e0   : > { %v1438_v5 = vpop.f32.mrf.mxu0 }
 0x7e8   : > { %v1440_v6 = vpop.f32.mrf.mxu0 }
 0x7e9   : > { %v1478_v7 = vpack.c.bf16 %v1440_v6, %v1438_v5 }
 0x7eb   : > { %2367 = vmatmul.msk.bf16.gmra.mxu1 %vm664_vm0, %v1478_v7 }
 0x7f0   : > { %v1443_v14 = vpop.f32.mrf.mxu0 }
 0x7f8   : > { %v1445_v16 = vpop.f32.mrf.mxu0 }
 0x7f9   : > { %v1479_v17 = vpack.c.bf16 %v1445_v16, %v1443_v14 }
 0x7fb   : > { %2368 = vmatmul.msk.bf16.gmra.mxu1 %vm664_vm0, %v1479_v17  ;;  %v3063_v17 = vld [vmem:[%s3190_s4 + $0x7] ss:$0 sm:$0xff] }
 0x800   : > { %v1448_v21 = vpop.f32.mrf.mxu0 }
 0x808   : > { %v1450_v24 = vpop.f32.mrf.mxu0 }
 0x809   : > { %v1480_v25 = vpack.c.bf16 %v1450_v24, %v1448_v21 }
 0x80b   : > { %2369 = vmatmul.msk.bf16.gmra.mxu1 %vm664_vm0, %v1480_v25 }
 0x818   : > { %v1539_v26 = vpop.f32.mrf.mxu1 }
 0x819   : > { %v1540_v28 = vadd.f32 %v2548_v27, %v1539_v26 }
 0x81b   : > { %v1579_v37 = vmax.f32 %v1540_v28, 0.0 }
 0x820   : > { %v1541_v29 = vpop.f32.mrf.mxu1 }
 0x821   : > { %v1542_v30 = vadd.f32 %v2548_v27, %v1541_v29 }
 0x823   : > { %v1580_v33 = vmax.f32 %v1542_v30, 0.0 }
 0x825   : > { %v1595_v32 = vpack.c.bf16 %v1580_v33, %v1579_v37 }
 0x827   : > { %2386 = vmatmul.msk.bf16.vlgmr.msra.gmra.mxu3 %vm664_vm0, %v1595_v32 }
 0x828   : > { %v1544_v34 = vpop.f32.mrf.mxu1 }
 0x829   : > { %v1545_v35 = vadd.f32 %v2548_v27, %v1544_v34 }
 0x82b   : > { %v1581_v10 = vmax.f32 %v1545_v35, 0.0 }
 0x830   : > { %v1546_v8 = vpop.f32.mrf.mxu1 }
 0x831   : > { %v1547_v9 = vadd.f32 %v2548_v27, %v1546_v8 }
 0x833   : > { %v1582_v11 = vmax.f32 %v1547_v9, 0.0 }
 0x835   : > { %v1596_v12 = vpack.c.bf16 %v1582_v11, %v1581_v10 }
 0x837   : > { %2387 = vmatmul.msk.bf16.gmra.mxu3 %vm664_vm0, %v1596_v12 }
 0x838   : > { %v1549_v36 = vpop.f32.mrf.mxu1 }
 0x839   : > { %v1550_v15 = vadd.f32 %v2548_v27, %v1549_v36 }
 0x83b   : > { %v1583_v20 = vmax.f32 %v1550_v15, 0.0 }
 0x840   : > { %v1551_v38 = vpop.f32.mrf.mxu1 }
 0x841   : > { %v1552_v39 = vadd.f32 %v2548_v27, %v1551_v38 }
 0x843   : > { %v1584_v40 = vmax.f32 %v1552_v39, 0.0 }
 0x845   : > { %v1597_v41 = vpack.c.bf16 %v1584_v40, %v1583_v20 }
 0x847   : > { %2388 = vmatmul.msk.bf16.gmra.mxu3 %vm664_vm0, %v1597_v41 }
 0x848   : > { %v1554_v23 = vpop.f32.mrf.mxu1 }
 0x849   : > { %v1555_v42 = vadd.f32 %v2548_v27, %v1554_v23 }
 0x84b   : > { %v1585_v45 = vmax.f32 %v1555_v42, 0.0 }
 0x850   : > { %v1556_v43 = vpop.f32.mrf.mxu1 }
 0x851   : > { %v1557_v44 = vadd.f32 %v2548_v27, %v1556_v43 }
 0x853   : > { %v1586_v31 = vmax.f32 %v1557_v44, 0.0 }
 0x855   : > { %v1598_v46 = vpack.c.bf16 %v1586_v31, %v1585_v45 }
 0x857   : > { %2389 = vmatmul.msk.bf16.gmra.mxu3 %vm664_vm0, %v1598_v46 }
 0x858   : > { %v1559_v47 = vpop.f32.mrf.mxu1 }
 0x859   : > { %v1560_v48 = vadd.f32 %v2548_v27, %v1559_v47 }
 0x85b   : > { %v1587_v51 = vmax.f32 %v1560_v48, 0.0 }
 0x860   : > { %v1561_v49 = vpop.f32.mrf.mxu1 }
 0x861   : > { %v1562_v50 = vadd.f32 %v2548_v27, %v1561_v49 }
 0x863   : > { %v1588_v52 = vmax.f32 %v1562_v50, 0.0 }
 0x865   : > { %v1599_v59 = vpack.c.bf16 %v1588_v52, %v1587_v51 }
 0x867   : > { %2390 = vmatmul.msk.bf16.gmra.mxu3 %vm664_vm0, %v1599_v59 }
 0x868   : > { %v1564_v55 = vpop.f32.mrf.mxu1 }
 0x869   : > { %v1565_v54 = vadd.f32 %v2548_v27, %v1564_v55 }
 0x86b   : > { %v1589_v60 = vmax.f32 %v1565_v54, 0.0 }
 0x870   : > { %v1566_v56 = vpop.f32.mrf.mxu1 }
 0x871   : > { %v1567_v58 = vadd.f32 %v2548_v27, %v1566_v56 }
 0x873   : > { %v1590_v61 = vmax.f32 %v1567_v58, 0.0 }
 0x875   : > { %v1600_v57 = vpack.c.bf16 %v1590_v61, %v1589_v60 }
 0x877   : > { %2391 = vmatmul.msk.bf16.gmra.mxu3 %vm664_vm0, %v1600_v57 }
 0x878   : > { %v1569_v62 = vpop.f32.mrf.mxu1 }
 0x879   : > { %v1570_v63 = vadd.f32 %v2548_v27, %v1569_v62 }
 0x87b   : > { %v1591_v2 = vmax.f32 %v1570_v63, 0.0 }
 0x880   : > { %v1571_v0 = vpop.f32.mrf.mxu1 }
 0x881   : > { %v1572_v1 = vadd.f32 %v2548_v27, %v1571_v0 }
 0x883   : > { %v1592_v3 = vmax.f32 %v1572_v1, 0.0 }
 0x885   : > { %v1601_v53 = vpack.c.bf16 %v1592_v3, %v1591_v2 }
 0x887   : > { %2392 = vmatmul.msk.bf16.gmra.mxu3 %vm664_vm0, %v1601_v53 }
 0x888   : > { %v1574_v4 = vpop.f32.mrf.mxu1 }
 0x889   : > { %v1575_v5 = vadd.f32 %v2548_v27, %v1574_v4 }
 0x88b   : > { %v1593_v13 = vmax.f32 %v1575_v5, 0.0 }
 0x890   : > { %v1576_v6 = vpop.f32.mrf.mxu1 }
 0x891   : > { %v1577_v7 = vadd.f32 %v2548_v27, %v1576_v6 }
 0x893   : > { %v1594_v14 = vmax.f32 %v1577_v7, 0.0 }
 0x895   : > { %v1602_v16 = vpack.c.bf16 %v1594_v14, %v1593_v13 }
 0x897   : > { %2393 = vmatmul.msk.bf16.gmra.mxu3 %vm664_vm0, %v1602_v16 }
 0x8aa   : > { %v1661_v18 = vpop.f32.mrf.mxu3 }
 0x8ab   : > { %v1662_v19 = vadd.f32 %v3063_v17, %v1661_v18 }
 0x8ad   : > { %v1701_v21 = vmax.f32 %v1662_v19, 0.0 }
 0x8af   : > { %v1717_v22 = vsel %vm664_vm0, %v1701_v21, 0.0 }
 0x8b0   : > { %v1718_v24 = vrot.slane %v1717_v22, 4 }
 0x8b2   : > { %v1719_v25 = vadd.f32 %v1718_v24, %v1717_v22  ;;  %v1663_v26 = vpop.f32.mrf.mxu3 }
 0x8b3   : > { %v1664_v27 = vadd.f32 %v3063_v17, %v1663_v26 }
 0x8b4   : > { %v1720_v28 = vrot.slane %v1719_v25, 2 }
 0x8b5   : > { %v1702_v29 = vmax.f32 %v1664_v27, 0.0 }
 0x8b6   : > { %v1721_v30 = vadd.f32 %v1720_v28, %v1719_v25 }
 0x8b7   : > { %v1724_v37 = vsel %vm664_vm0, %v1702_v29, 0.0 }
 0x8b8   : > { %v1725_v33 = vrot.slane %v1724_v37, 4  ;;  %v1722_v32 = vrot.slane %v1721_v30, 1 }
 0x8ba   : > { %v1726_v34 = vadd.f32 %v1725_v33, %v1724_v37  ;;  %v1666_v35 = vpop.f32.mrf.mxu3  ;;  %v3070_v11 = vadd.f32 %v1722_v32, %v1721_v30 }
 0x8bb   : > { %v1667_v8 = vadd.f32 %v3063_v17, %v1666_v35 }
 0x8bc   : > { %v1727_v9 = vrot.slane %v1726_v34, 2  ;;  %v1829_v39 = vpack.c.bf16 %v3070_v11, %v3070_v11 }
 0x8bd   : > { %v1703_v10 = vmax.f32 %v1667_v8, 0.0 }
 0x8be   : > { %v1728_v12 = vadd.f32 %v1727_v9, %v1726_v34  ;;  %v1870_v45 = vunpack.c.l.b16 %v1829_v39 }
 0x8bf   : > { %v1731_v36 = vsel %vm664_vm0, %v1703_v10, 0.0 }
 0x8c0   : > { %v1729_v15 = vrot.slane %v1728_v12, 1  ;;  %v1732_v38 = vrot.slane %v1731_v36, 4 }
 0x8c2   : > { %v3075_v20 = vadd.f32 %v1729_v15, %v1728_v12  ;;  %v1733_v40 = vadd.f32 %v1732_v38, %v1731_v36  ;;  %v1668_v41 = vpop.f32.mrf.mxu3 }
 0x8c3   : > { %v1669_v23 = vadd.f32 %v3063_v17, %v1668_v41 }
 0x8c4   : > { %v1830_v42 = vpack.c.bf16 %v3075_v20, %v3075_v20  ;;  %v1734_v43 = vrot.slane %v1733_v40, 2 }
 0x8c5   : > { %v1704_v44 = vmax.f32 %v1669_v23, 0.0 }
 0x8c6   : > { %v1871_v31 = vunpack.c.l.b16 %v1830_v42  ;;  %v1735_v46 = vadd.f32 %v1734_v43, %v1733_v40 }
 0x8c7   : > { %v1738_v47 = vsel %vm664_vm0, %v1704_v44, 0.0 }
 0x8c8   : > { %v1887_v48 = vsel %vm1886_vm1, %v1871_v31, %v1870_v45  ;;  %v1736_v49 = vrot.slane %v1735_v46, 1  ;;  %v1739_v50 = vrot.slane %v1738_v47, 4 }
 0x8ca   : > { %v3082_v51 = vadd.f32 %v1736_v49, %v1735_v46  ;;  %v1740_v52 = vadd.f32 %v1739_v50, %v1738_v47  ;;  %v1671_v59 = vpop.f32.mrf.mxu3  ;;  %v1965_v47 = vsel %vm1886_vm1, %v3075_v20, %v3070_v11 }
 0x8cb   : > { %v1672_v55 = vadd.f32 %v3063_v17, %v1671_v59 }
 0x8cc   : > { %v1831_v54 = vpack.c.bf16 %v3082_v51, %v3082_v51  ;;  %v1741_v56 = vrot.slane %v1740_v52, 2  ;;  %v1966_v50 = vsel %vm1888_vm2, %v3082_v51, %v1965_v47 }
 0x8cd   : > { %v1705_v58 = vmax.f32 %v1672_v55, 0.0 }
 0x8ce   : > { %v1872_v60 = vunpack.c.l.b16 %v1831_v54  ;;  %v1742_v61 = vadd.f32 %v1741_v56, %v1740_v52 }
 0x8cf   : > { %v1745_v57 = vsel %vm664_vm0, %v1705_v58, 0.0 }
 0x8d0   : > { %v1889_v62 = vsel %vm1888_vm2, %v1872_v60, %v1887_v48  ;;  %v1743_v63 = vrot.slane %v1742_v61, 1  ;;  %v1746_v0 = vrot.slane %v1745_v57, 4 }
 0x8d2   : > { %v1744_v1 = vadd.f32 %v1743_v63, %v1742_v61  ;;  %v1747_v2 = vadd.f32 %v1746_v0, %v1745_v57  ;;  %v1673_v3 = vpop.f32.mrf.mxu3 }
 0x8d3   : > { %v1674_v53 = vadd.f32 %v3063_v17, %v1673_v3 }
 0x8d4   : > { %v1832_v4 = vpack.c.bf16 %v1744_v1, %v1744_v1  ;;  %v1748_v5 = vrot.slane %v1747_v2, 2  ;;  %v1967_v52 = vsel %vm1890_vm3, %v1744_v1, %v1966_v50 }
 0x8d5   : > { %v1706_v6 = vmax.f32 %v1674_v53, 0.0 }
 0x8d6   : > { %v1873_v7 = vunpack.c.l.b16 %v1832_v4  ;;  %v1749_v13 = vadd.f32 %v1748_v5, %v1747_v2  ;;  %v2473_v4 = vld [vmem:[#allocation7 + $0xf8] sm:$0xff] }
 0x8d7   : > { %v1752_v14 = vsel %vm664_vm0, %v1706_v6, 0.0  ;;  %1939 = vmatpush.bf16.msrb.mxu2 %v2473_v4 }
 0x8d8   : > { %v1891_v16 = vsel %vm1890_vm3, %v1873_v7, %v1889_v62  ;;  %v1750_v18 = vrot.slane %v1749_v13, 1  ;;  %v1753_v19 = vrot.slane %v1752_v14, 4 }
 0x8da   : > { %v1751_v21 = vadd.f32 %v1750_v18, %v1749_v13  ;;  %v1754_v22 = vadd.f32 %v1753_v19, %v1752_v14  ;;  %v1676_v24 = vpop.f32.mrf.mxu3  ;;  %v2472_v18 = vld [vmem:[#allocation7 + $0xf0] sm:$0xff] }
 0x8db   : > { %v1677_v25 = vadd.f32 %v3063_v17, %v1676_v24  ;;  %1940 = vmatpush.bf16.msrb.mxu2 %v2472_v18 }
 0x8dc   : > { %v1833_v26 = vpack.c.bf16 %v1751_v21, %v1751_v21  ;;  %v1755_v27 = vrot.slane %v1754_v22, 2  ;;  %v1968_v54 = vsel %vm1892_vm4, %v1751_v21, %v1967_v52 }
 0x8dd   : > { %v1707_v28 = vmax.f32 %v1677_v25, 0.0 }
 0x8de   : > { %v1874_v29 = vunpack.c.l.b16 %v1833_v26  ;;  %v1756_v30 = vadd.f32 %v1755_v27, %v1754_v22 }
 0x8df   : > { %v1759_v37 = vsel %vm664_vm0, %v1707_v28, 0.0  ;;  %v2471_v28 = vld [vmem:[#allocation7 + $0xe8] sm:$0xff] }
 0x8e0   : > { %v1893_v33 = vsel %vm1892_vm4, %v1874_v29, %v1891_v16  ;;  %v1757_v32 = vrot.slane %v1756_v30, 1  ;;  %v1760_v34 = vrot.slane %v1759_v37, 4  ;;  %1941 = vmatpush.bf16.msrb.mxu2 %v2471_v28 }
 0x8e2   : > { %v1758_v35 = vadd.f32 %v1757_v32, %v1756_v30  ;;  %v1761_v8 = vadd.f32 %v1760_v34, %v1759_v37  ;;  %v1678_v9 = vpop.f32.mrf.mxu3 }
 0x8e3   : > { %v1679_v10 = vadd.f32 %v3063_v17, %v1678_v9 }
 0x8e4   : > { %v1834_v12 = vpack.c.bf16 %v1758_v35, %v1758_v35  ;;  %v1762_v36 = vrot.slane %v1761_v8, 2  ;;  %v1969_v56 = vsel %vm1894_vm5, %v1758_v35, %v1968_v54 }
 0x8e5   : > { %v1708_v15 = vmax.f32 %v1679_v10, 0.0 }
 0x8e6   : > { %v1875_v38 = vunpack.c.l.b16 %v1834_v12  ;;  %v1763_v39 = vadd.f32 %v1762_v36, %v1761_v8  ;;  %v2470_v8 = vld [vmem:[#allocation7 + $0xe0] sm:$0xff] }
 0x8e7   : > { %v1766_v40 = vsel %vm664_vm0, %v1708_v15, 0.0  ;;  %1942 = vmatpush.bf16.msrb.mxu2 %v2470_v8 }
 0x8e8   : > { %v1895_v41 = vsel %vm1894_vm5, %v1875_v38, %v1893_v33  ;;  %v1764_v23 = vrot.slane %v1763_v39, 1  ;;  %v1767_v42 = vrot.slane %v1766_v40, 4 }
 0x8ea   : > { %v1765_v43 = vadd.f32 %v1764_v23, %v1763_v39  ;;  %v1768_v44 = vadd.f32 %v1767_v42, %v1766_v40  ;;  %v1681_v45 = vpop.f32.mrf.mxu3 }
 0x8eb   : > { %v1682_v2 = vadd.f32 %v3063_v17, %v1681_v45 }
 0x8ec   : > { %v1835_v31 = vpack.c.bf16 %v1765_v43, %v1765_v43  ;;  %v1769_v46 = vrot.slane %v1768_v44, 2  ;;  %v1970_v11 = vsel %vm1896_vm6, %v1765_v43, %v1969_v56 }
 0x8ed   : > { %v1709_v13 = vmax.f32 %v1682_v2, 0.0 }
 0x8ee   : > { %v1876_v48 = vunpack.c.l.b16 %v1835_v31  ;;  %v1770_v49 = vadd.f32 %v1769_v46, %v1768_v44 }
 0x8ef   : > { %v1773_v22 = vsel %vm664_vm0, %v1709_v13, 0.0 }
 0x8f0   : > { %v1897_v59 = vsel %vm1896_vm6, %v1876_v48, %v1895_v41  ;;  %v1771_v55 = vrot.slane %v1770_v49, 1  ;;  %v1774_v37 = vrot.slane %v1773_v22, 4 }
 0x8f2   : > { %v1772_v58 = vadd.f32 %v1771_v55, %v1770_v49  ;;  %v1683_v60 = vpop.f32.mrf.mxu3  ;;  %v1775_v12 = vadd.f32 %v1774_v37, %v1773_v22 }
 0x8f3   : > { %v1684_v0 = vadd.f32 %v3063_v17, %v1683_v60 }
 0x8f4   : > { %v1836_v20 = vpack.c.bf16 %v1772_v58, %v1772_v58  ;;  %v1971_v61 = vsel %vm1898_vm7, %v1772_v58, %v1970_v11  ;;  %v1776_v43 = vrot.slane %v1775_v12, 2 }
 0x8f5   : > { %1981 = vst.msk [vmem:[%s3110_s29] sm:$0xff] %vm664_vm0, %v1971_v61  ;;  %v1710_v5 = vmax.f32 %v1684_v0, 0.0 }
 0x8f6   : > { %v1877_v51 = vunpack.c.l.b16 %v1836_v20  ;;  %v1777_v50 = vadd.f32 %v1776_v43, %v1775_v12 }
 0x8f7   : > { %v1780_v19 = vsel %vm664_vm0, %v1710_v5, 0.0 }
 0x8f8   : > { %v3115_v57 = vsel %vm1898_vm7, %v1877_v51, %v1897_v59  ;;  %v1781_v25 = vrot.slane %v1780_v19, 4  ;;  %v1778_v61 = vrot.slane %v1777_v50, 1 }
 0x8fa   : > { %v1686_v62 = vpop.f32.mrf.mxu3  ;;  %v1782_v35 = vadd.f32 %v1781_v25, %v1780_v19  ;;  %v1779_v5 = vadd.f32 %v1778_v61, %v1777_v50 }
 0x8fb   : > { %v1687_v1 = vadd.f32 %v3063_v17, %v1686_v62 }
 0x8fc   : > { %v1783_v39 = vrot.slane %v1782_v35, 2  ;;  %v1837_v22 = vpack.c.bf16 %v1779_v5, %v1779_v5 }
 0x8fd   : > { %v1711_v7 = vmax.f32 %v1687_v1, 0.0 }
 0x8fe   : > { %v1784_v46 = vadd.f32 %v1783_v39, %v1782_v35 }
 0x8ff   : > { %v1787_v21 = vsel %vm664_vm0, %v1711_v7, 0.0 }
 0x900   : > { %v1788_v29 = vrot.slane %v1787_v21, 4  ;;  %v1785_v54 = vrot.slane %v1784_v46, 1 }
 0x902   : > { %v1688_v63 = vpop.f32.mrf.mxu3  ;;  %v1789_v9 = vadd.f32 %v1788_v29, %v1787_v21  ;;  %v1786_v1 = vadd.f32 %v1785_v54, %v1784_v46 }
 0x903   : > { %v1689_v3 = vadd.f32 %v3063_v17, %v1688_v63 }
 0x904   : > { %v1790_v23 = vrot.slane %v1789_v9, 2  ;;  %v1972_v28 = vsel %vm1886_vm1, %v1786_v1, %v1779_v5 }
 0x905   : > { %v1712_v14 = vmax.f32 %v1689_v3, 0.0 }
 0x906   : > { %v1791_v48 = vadd.f32 %v1790_v23, %v1789_v9 }
 0x907   : > { %v1794_v24 = vsel %vm664_vm0, %v1712_v14, 0.0 }
 0x908   : > { %v1795_v33 = vrot.slane %v1794_v24, 4  ;;  %v1792_v11 = vrot.slane %v1791_v48, 1 }
 0x90a   : > { %v1691_v53 = vpop.f32.mrf.mxu3  ;;  %v1796_v36 = vadd.f32 %v1795_v33, %v1794_v24 }
 0x90b   : > { %v1692_v6 = vadd.f32 %v3063_v17, %v1691_v53  ;;  %v1793_v53 = vadd.f32 %v1792_v11, %v1791_v48 }
 0x90c   : > { %v1797_v44 = vrot.slane %v1796_v36, 2 }
 0x90d   : > { %v1713_v16 = vmax.f32 %v1692_v6, 0.0  ;;  %v1973_v33 = vsel %vm1888_vm2, %v1793_v53, %v1972_v28 }
 0x90e   : > { %v1798_v52 = vadd.f32 %v1797_v44, %v1796_v36 }
 0x90f   : > { %v1801_v26 = vsel %vm664_vm0, %v1713_v16, 0.0  ;;  %v1838_v16 = vpack.c.bf16 %v1786_v1, %v1786_v1 }
 0x910   : > { %v1802_v32 = vrot.slane %v1801_v26, 4  ;;  %v1799_v51 = vrot.slane %v1798_v52, 1 }
 0x912   : > { %v1693_v27 = vpop.f32.mrf.mxu3  ;;  %v1803_v38 = vadd.f32 %v1802_v32, %v1801_v26  ;;  %v1800_v6 = vadd.f32 %v1799_v51, %v1798_v52 }
 0x913   : > { %v1694_v30 = vadd.f32 %v3063_v17, %v1693_v27  ;;  %v1879_v27 = vunpack.c.l.b16 %v1838_v16 }
 0x914   : > { %v1804_v45 = vrot.slane %v1803_v38, 2  ;;  %v1840_v24 = vpack.c.bf16 %v1800_v6, %v1800_v6  ;;  %v1974_v8 = vsel %vm1890_vm3, %v1800_v6, %v1973_v33 }
 0x915   : > { %v1714_v34 = vmax.f32 %v1694_v30, 0.0 }
 0x916   : > { %v1805_v55 = vadd.f32 %v1804_v45, %v1803_v38  ;;  %v1881_v35 = vunpack.c.l.b16 %v1840_v24 }
 0x917   : > { %v1808_v10 = vsel %vm664_vm0, %v1714_v34, 0.0  ;;  %v1878_v34 = vunpack.c.l.b16 %v1837_v22 }
 0x918   : > { %v1809_v15 = vrot.slane %v1808_v10, 4  ;;  %v1806_v63 = vrot.slane %v1805_v55, 1 }
 0x919   : > { %v1900_v36 = vsel %vm1886_vm1, %v1879_v27, %v1878_v34 }
 0x91a   : > { %v1810_v40 = vadd.f32 %v1809_v15, %v1808_v10  ;;  %v1696_v41 = vpop.f32.mrf.mxu3  ;;  %v1807_v14 = vadd.f32 %v1806_v63, %v1805_v55 }
 0x91b   : > { %v1697_v42 = vadd.f32 %v3063_v17, %v1696_v41 }
 0x91c   : > { %v1811_v47 = vrot.slane %v1810_v40, 2  ;;  %v1841_v26 = vpack.c.bf16 %v1807_v14, %v1807_v14  ;;  %v1975_v12 = vsel %vm1892_vm4, %v1807_v14, %v1974_v8 }
 0x91d   : > { %v1715_v31 = vmax.f32 %v1697_v42, 0.0 }
 0x91e   : > { %v1812_v56 = vadd.f32 %v1811_v47, %v1810_v40  ;;  %v1882_v10 = vunpack.c.l.b16 %v1841_v26 }
 0x91f   : > { %v1815_v49 = vsel %vm664_vm0, %v1715_v31, 0.0 }
 0x920   : > { %v1816_v59 = vrot.slane %v1815_v49, 4  ;;  %v1813_v2 = vrot.slane %v1812_v56, 1 }
 0x922   : > { %v1817_v58 = vadd.f32 %v1816_v59, %v1815_v49  ;;  %v1698_v60 = vpop.f32.mrf.mxu3  ;;  %v1814_v18 = vadd.f32 %v1813_v2, %v1812_v56 }
 0x923   : > { %v1699_v20 = vadd.f32 %v3063_v17, %v1698_v60  ;;  %v1839_v17 = vpack.c.bf16 %v1793_v53, %v1793_v53 }
 0x924   : > { %v1818_v62 = vrot.slane %v1817_v58, 2  ;;  %v1842_v29 = vpack.c.bf16 %v1814_v18, %v1814_v18  ;;  %v1976_v38 = vsel %vm1894_vm5, %v1814_v18, %v1975_v12 }
 0x925   : > { %v1716_v0 = vmax.f32 %v1699_v20, 0.0  ;;  %v1880_v37 = vunpack.c.l.b16 %v1839_v17 }
 0x926   : > { %v1819_v3 = vadd.f32 %v1818_v62, %v1817_v58  ;;  %v1883_v15 = vunpack.c.l.b16 %v1842_v29 }
 0x927   : > { %v1822_v4 = vsel %vm664_vm0, %v1716_v0, 0.0  ;;  %v1901_v40 = vsel %vm1888_vm2, %v1880_v37, %v1900_v36 }
 0x928   : > { %v1820_v7 = vrot.slane %v1819_v3, 1  ;;  %v1823_v13 = vrot.slane %v1822_v4, 4  ;;  %v1902_v42 = vsel %vm1890_vm3, %v1881_v35, %v1901_v40 }
 0x929   : > { %v1903_v45 = vsel %vm1892_vm4, %v1882_v10, %v1902_v42 }
 0x92a   : > { %v1824_v19 = vadd.f32 %v1823_v13, %v1822_v4  ;;  %v1821_v21 = vadd.f32 %v1820_v7, %v1819_v3  ;;  %v1904_v31 = vsel %vm1894_vm5, %v1883_v15, %v1903_v45 }
 0x92c   : > { %v1825_v25 = vrot.slane %v1824_v19, 2  ;;  %v1843_v32 = vpack.c.bf16 %v1821_v21, %v1821_v21  ;;  %v1977_v23 = vsel %vm1896_vm6, %v1821_v21, %v1976_v38 }
 0x92e   : > { %v1826_v30 = vadd.f32 %v1825_v25, %v1824_v19  ;;  %v1884_v41 = vunpack.c.l.b16 %v1843_v32 }
 0x930   : > { %v1827_v9 = vrot.slane %v1826_v30, 1  ;;  %v1905_v47 = vsel %vm1896_vm6, %v1884_v41, %v1904_v31 }
 0x932   : > { %v1828_v39 = vadd.f32 %v1827_v9, %v1826_v30 }
 0x934   : > { %v1844_v43 = vpack.c.bf16 %v1828_v39, %v1828_v39  ;;  %v1978_v44 = vsel %vm1898_vm7, %v1828_v39, %v1977_v23 }
 0x935   : > { %1982 = vst.msk [vmem:[%s3110_s29 + $0x8] sm:$0xff] %vm664_vm0, %v1978_v44 }
 0x936   : > { %v1885_v46 = vunpack.c.l.b16 %v1844_v43 }
 0x938   : > { %v1906_v48 = vsel %vm1898_vm7, %v1885_v46, %v1905_v47 }
 0x939   : > { %v1907_v49 = vpack.c.b16 %v1906_v48, %v3115_v57 }
 0x93b   : > { %2410 = vmatmul.msk.bf16.vlgmr.msrb.gmra.mxu2 %vm664_vm0, %v1907_v49 }
 0x9be   : > { %v1944_v50 = vpop.f32.mrf.mxu2 }
 0x9bf   : > { %1985 = vrot.lane.b32.xlu0 %v1944_v50, %s2727_s6 }
 0x9c6   : > { %v1946_v52 = vpop.f32.mrf.mxu2 }
 0x9c7   : > { %1987 = vrot.lane.b32.xlu0 %v1946_v52, %s2727_s6 }
 0xa31   : > { %v1986_v59 = vpop.permute.xlu0 %1985 }
 0xa32   : > { %1992 = vst.msk [vmem:[%s3110_s29] sm:$0xff] %vm1991_vm8, %v1986_v59 }
 0xa39   : > { %v1988_v57 = vpop.permute.xlu0 %1987 }
 0xa3a   : > { %1993 = vst.msk [vmem:[%s3110_s29 + $0x8] sm:$0xff] %vm1991_vm8, %v1988_v57 }
 0xa3b   : > { %2675 = shalt.err (!%p2672_p10)
}
 0xa3c   : > { %s2728_s27 = smov 128   ;;  %s2729_s0 = smov 8  }
 0xa3d   : > { %2483 = dma.vmem_to_hbm [thread:$0]  (%p2829_p5), %s2008_s12, 256, %s2010_s14, %s1995_s10, %s2728_s27, %s2728_s27, %s2729_s0  }
 0xa3e PF: > { %p2503_p11 = scmp.ge.s32.totalorder %s2722_s21, 2  ;;  %s2024_s30 = sand.u32 1, %s2710_s18  }
 0xa3f   : > { %s2025_s3 = scalar_lea.sflag [#allocation4], %s2024_s30 }
 0xa40   : > { %p2497_p12 = pnand %p2503_p11, %p2795_p6 }
 0xa42   : > { %p2498_p13 = pneg %p2497_p12 }
 0xa44   : > { %2705 = dma.done.wait (%p2498_p13), %s2025_s3, 256  }
 0xa45   : > { %2707 = vsyncadd (%p2498_p13), %s2025_s3, 4294967040  ;;  %s3208_s29 = sld [smem:[#allocation13_spill]]  ;;  %p21_p0 = scmp.ge.s32.totalorder %s2812_s7, 6  }
 0xa46   : > { %s3209_s18 = smov %s2714_s19  ;;  %s3210_s19 = smov %s2718_s20 }
 0xa47   : > { %s3212_s21 = smov %s2812_s7  ;;  %23 = sbr.rel (!%p21_p0) target bundleno = 10 (0xa), region = 109 }
 0xa4b   : > { %s3211_s20 = smov %s3208_s29 }
 0xa4c   :  { %2031 = vsyncpa [#allocation3], 1 }
 0xa4d   :  { %2033 = vsyncpa [#allocation3 + $0x1], 1 }
 0xa4e   :  { %2034 = vsyncpa [#allocation6], 1 }
 0xa4f   :  { %2036 = vsyncpa [#allocation6 + $0x1], 1 }
 0xa50   :  { %2037 = vsyncpa [#allocation4], 1 }
 0xa51   :  { %2039 = vsyncpa [#allocation4 + $0x1], 1 }

</bundles_post_ra>
